<compile_context>
chip_gen: v5e
topology: v5e:2x2
jax: 0.10.0
libtpu: 0.0.40
codegen_flags: <defaults>
</compile_context>

<pallas_src>
import functools

import jax
import jax.numpy as jnp
import numpy as np
from jax.experimental import pallas as pl
from jax.experimental.pallas import tpu as pltpu


# ----------------------------------------------------------------------------
# Helpers
# ----------------------------------------------------------------------------
def _round_up(x, m):
    return ((x + m - 1) // m) * m


# ----------------------------------------------------------------------------
# Fused Pallas kernel: all LSTM layers + final Linear
# ----------------------------------------------------------------------------
def _nnlstm_kernel(x_ref, w_ref, out_ref, gin_sc, hseq_sc, *,
                   T, Bp, H, L, Dp, Op,
                   off_ih0, off_ih, off_hh, off_fc, off_bias):
    """Single-invocation fused forward.

    x_ref   : (T*Bp, Dp)   time-major, batch-padded, flattened input
    w_ref   : (R, Wlane)   packed weights/biases/constants (static row offsets)
    out_ref : (Bp, Op)     lane-dense output
    gin_sc  : (T*Bp, 4H)   hoisted input-projection gates (per layer)
    hseq_sc : (T*Bp, H)    inter-layer hidden sequence (VMEM resident)

    Weight columns for i/f/o gates are pre-scaled by 0.5 at prepack time, so
    sigmoid(a) = 0.5*tanh(0.5*a) + 0.5 becomes one full-vreg tanh + one
    full-vreg affine (sc/of rows live in w_ref).
    """
    G4 = 4 * H

    # Gate post-affine constants: sc = [.5,.5,1,.5], of = [.5,.5,0,.5] per block.
    sc_row = off_bias + L + 1
    of_row = off_bias + L + 2
    sc = jnp.broadcast_to(w_ref[sc_row:sc_row + 1, 0:G4], (Bp, G4))
    of = jnp.broadcast_to(w_ref[of_row:of_row + 1, 0:G4], (Bp, G4))

    h_last = None
    for l in range(L):                          # static unroll over layers
        b_l = w_ref[off_bias + l:off_bias + l + 1, 0:G4]        # (1, 4H)

        # ---- hoisted input projection: ONE MXU matmul over all timesteps ----
        if l == 0:
            w_in = w_ref[off_ih0:off_ih0 + Dp, 0:G4]            # (Dp, 4H)
            gin_sc[...] = jnp.dot(x_ref[...], w_in,
                                  preferred_element_type=jnp.float32) + b_l
        else:
            w_in = w_ref[off_ih[l - 1]:off_ih[l - 1] + H, 0:G4]  # (H, 4H)
            gin_sc[...] = jnp.dot(hseq_sc[...], w_in,
                                  preferred_element_type=jnp.float32) + b_l

        w_hh_l = w_ref[off_hh[l]:off_hh[l] + H, 0:G4]           # (H, 4H)
        last_layer = (l == L - 1)

        h = jnp.zeros((Bp, H), jnp.float32)
        c = jnp.zeros((Bp, H), jnp.float32)

        # ---- serial recurrence: one small matmul + one full-vreg tanh/step ----
        # TODO(synk): for long sequences, move this to a chunked time grid axis
        # (and lax.fori_loop with modest unroll) instead of static unrolling.
        for t in range(T):                      # static unroll (T is small)
            g = gin_sc[t * Bp:(t + 1) * Bp, :] + jnp.dot(
                h, w_hh_l, preferred_element_type=jnp.float32)
            y = jnp.tanh(g)                     # ONE full (Bp, 4H) EUP tanh
            z = y * sc + of                     # sigmoid for i/f/o, tanh for g
            i_g = z[:, 0 * H:1 * H]
            f_g = z[:, 1 * H:2 * H]
            g_g = z[:, 2 * H:3 * H]
            o_g = z[:, 3 * H:4 * H]
            c = f_g * c + i_g * g_g
            h = o_g * jnp.tanh(c)
            if not last_layer:
                hseq_sc[t * Bp:(t + 1) * Bp, :] = h
        h_last = h

    # ---- fused final Linear on the last timestep of the last layer ----
    w_fc = w_ref[off_fc:off_fc + H, 0:Op]
    b_fc = w_ref[off_bias + L:off_bias + L + 1, 0:Op]
    out_ref[...] = (
        jnp.dot(h_last, w_fc, preferred_element_type=jnp.float32) + b_fc
    ).astype(out_ref.dtype)


# ----------------------------------------------------------------------------
# One-time weight prepack (hoisted out of the per-call path)
# ----------------------------------------------------------------------------
def prepack_nnlstm_params(lstm_params, w_fc, b_fc):
    """Pack all LSTM + FC parameters into one lane-dense (R, Wlane) buffer.

    i/f/o gate columns are pre-scaled by 0.5 (sigmoid-via-tanh trick); the
    post-tanh affine constants (sc, of) are stored as two extra rows.
    """
    L = len(lstm_params)
    H = lstm_params[0][1].shape[1]
    D = lstm_params[0][0].shape[1]
    O = w_fc.shape[0]
    G4 = 4 * H

    Dp = _round_up(max(D, 8), 8)
    Hr = _round_up(H, 8)
    Op = _round_up(max(O, 128), 128)
    Wlane = max(G4, Op)

    col_scale = np.concatenate([np.full(H, 0.5), np.full(H, 0.5),
                                np.ones(H), np.full(H, 0.5)]).astype(np.float32)
    post_sc = col_scale
    post_of = np.concatenate([np.full(H, 0.5), np.full(H, 0.5),
                              np.zeros(H), np.full(H, 0.5)]).astype(np.float32)

    # Row layout (all blocks start 8-aligned).
    off_ih0 = 0
    cur = Dp
    off_ih = []
    for _ in range(1, L):
        off_ih.append(cur)
        cur += Hr
    off_hh = []
    for _ in range(L):
        off_hh.append(cur)
        cur += Hr
    off_fc = cur
    cur += Hr
    off_bias = cur
    cur += _round_up(L + 3, 8)          # L lstm biases + fc bias + sc + of
    R = cur

    buf = np.zeros((R, Wlane), np.float32)

    # Layer 0 input->gate weights (PyTorch (4H, D) -> transposed, pre-scaled).
    w_ih0 = np.asarray(lstm_params[0][0], np.float32)
    buf[off_ih0:off_ih0 + D, 0:G4] = w_ih0.T * col_scale[None, :]

    # Layers 1..L-1 input->gate weights.
    for idx in range(L - 1):
        w_ih = np.asarray(lstm_params[idx + 1][0], np.float32)   # (4H, H)
        buf[off_ih[idx]:off_ih[idx] + H, 0:G4] = w_ih.T * col_scale[None, :]

    # Hidden->gate weights.
    for l in range(L):
        w_hh = np.asarray(lstm_params[l][1], np.float32)          # (4H, H)
        buf[off_hh[l]:off_hh[l] + H, 0:G4] = w_hh.T * col_scale[None, :]

    # Final Linear weight (PyTorch (O, H) -> transposed, zero-padded).
    buf[off_fc:off_fc + H, 0:O] = np.asarray(w_fc, np.float32).T

    # Biases (combined b_ih + b_hh, pre-scaled), fc bias, gate constants.
    for l in range(L):
        b = (np.asarray(lstm_params[l][2], np.float32)
             + np.asarray(lstm_params[l][3], np.float32)) * col_scale
        buf[off_bias + l, 0:G4] = b
    buf[off_bias + L, 0:O] = np.asarray(b_fc, np.float32)
    buf[off_bias + L + 1, 0:G4] = post_sc
    buf[off_bias + L + 2, 0:G4] = post_of

    meta = dict(L=L, H=H, D=D, O=O, Dp=Dp, Op=Op,
                off_ih0=off_ih0, off_ih=tuple(off_ih), off_hh=tuple(off_hh),
                off_fc=off_fc, off_bias=off_bias)
    return jnp.asarray(buf), meta


# ----------------------------------------------------------------------------
# Per-call wrapper (only x prep + one pallas_call)
# ----------------------------------------------------------------------------
def nn_lstm_forward(x_btd, packed_w, meta):
    """Full NNLSTM forward.  x_btd: (B, T, D) batch-first like PyTorch."""
    B, T, D = x_btd.shape
    L, H, O = meta["L"], meta["H"], meta["O"]
    Dp, Op = meta["Dp"], meta["Op"]
    Bp = _round_up(max(B, 8), 8)            # sublane multiple

    f32 = jnp.float32
    # Time-major, batch/feature zero-padded, flattened to (T*Bp, Dp).
    x_tbd = jnp.swapaxes(x_btd, 0, 1).astype(f32)                  # (T, B, D)
    x_pad = jnp.pad(x_tbd, ((0, 0), (0, Bp - B), (0, Dp - D)))
    x_flat = x_pad.reshape(T * Bp, Dp)

    kern = functools.partial(
        _nnlstm_kernel, T=T, Bp=Bp, H=H, L=L, Dp=Dp, Op=Op,
        off_ih0=meta["off_ih0"], off_ih=meta["off_ih"],
        off_hh=meta["off_hh"], off_fc=meta["off_fc"],
        off_bias=meta["off_bias"])

    out_p = pl.pallas_call(
        kern,
        out_shape=jax.ShapeDtypeStruct((Bp, Op), f32),
        grid=(1,),
        in_specs=[
            pl.BlockSpec((T * Bp, Dp), lambda i: (0, 0)),
            pl.BlockSpec(packed_w.shape, lambda i: (0, 0)),
        ],
        out_specs=pl.BlockSpec((Bp, Op), lambda i: (0, 0)),
        scratch_shapes=[
            pltpu.VMEM((T * Bp, 4 * H), jnp.float32),   # hoisted gate projections
            pltpu.VMEM((T * Bp, H), jnp.float32),       # inter-layer hidden sequence
        ],
    )(x_flat, packed_w)

    return out_p[:B, :O]


# ----------------------------------------------------------------------------
# Pure-JAX reference (correctness sanity check)
# ----------------------------------------------------------------------------
def nn_lstm_reference(x_btd, lstm_params, w_fc, b_fc):
    inp = x_btd
    B = inp.shape[0]
    for (w_ih, w_hh, b_ih, b_hh) in lstm_params:
        H = w_hh.shape[1]

        def step(carry, x_t):
            h, c = carry
            gates = x_t @ w_ih.T + b_ih + h @ w_hh.T + b_hh
            i_g, f_g, g_g, o_g = jnp.split(gates, 4, axis=-1)
            i_g = jax.nn.sigmoid(i_g)
            f_g = jax.nn.sigmoid(f_g)
            g_g = jnp.tanh(g_g)
            o_g = jax.nn.sigmoid(o_g)
            c = f_g * c + i_g * g_g
            h = o_g * jnp.tanh(c)
            return (h, c), h

        init = (jnp.zeros((B, H), jnp.float32), jnp.zeros((B, H), jnp.float32))
        _, hs = jax.lax.scan(step, init, jnp.swapaxes(inp, 0, 1))
        inp = jnp.swapaxes(hs, 0, 1)
    return inp[:, -1, :] @ w_fc.T + b_fc


# ----------------------------------------------------------------------------
# Deterministic parameter construction (PyTorch-style uniform init)
# ----------------------------------------------------------------------------
def make_params(key, input_dim, output_dim, hidden_dim, num_layers):
    k = 1.0 / np.sqrt(hidden_dim)
    lstm_params = []
    for layer in range(num_layers):
        in_dim = input_dim if layer == 0 else hidden_dim
        key, k1, k2, k3, k4 = jax.random.split(key, 5)
        w_ih = jax.random.uniform(k1, (4 * hidden_dim, in_dim), jnp.float32, -k, k)
        w_hh = jax.random.uniform(k2, (4 * hidden_dim, hidden_dim), jnp.float32, -k, k)
        b_ih = jax.random.uniform(k3, (4 * hidden_dim,), jnp.float32, -k, k)
        b_hh = jax.random.uniform(k4, (4 * hidden_dim,), jnp.float32, -k, k)
        lstm_params.append((w_ih, w_hh, b_ih, b_hh))
    key, k5, k6 = jax.random.split(key, 3)
    w_fc = jax.random.uniform(k5, (output_dim, hidden_dim), jnp.float32, -k, k)
    b_fc = jax.random.uniform(k6, (output_dim,), jnp.float32, -k, k)
    return lstm_params, w_fc, b_fc


if __name__ == "__main__":
    # Shapes consistent with the module: NNLSTM(input_dim=4, output_dim=3,
    # hidden_dim=32, num_layers=2, dropout_rate=0.1); x: (batch=2, seq=8, input_dim=4)
    B, T, D, H, O, L = 2, 8, 4, 32, 3, 2

    key = jax.random.PRNGKey(0)
    key, kx = jax.random.split(key)
    x = jax.random.normal(kx, (B, T, D), jnp.float32)

    lstm_params, w_fc, b_fc = make_params(key, D, O, H, L)

    # One-time prepack (hoisted out of the per-call path).
    packed_w, meta = prepack_nnlstm_params(lstm_params, w_fc, b_fc)

    out = nn_lstm_forward(x, packed_w, meta)
    out = jax.block_until_ready(out)

    ref = jax.block_until_ready(nn_lstm_reference(x, lstm_params, w_fc, b_fc))
    np.testing.assert_allclose(np.asarray(out), np.asarray(ref), rtol=1e-4, atol=1e-4)

    assert out.shape == (B, O)
    print("KERNEL_OK")
</pallas_src>

<mosaic_0001>
module attributes {stable_mosaic.version = 11 : i64} {
  func.func @_nnlstm_kernel(%arg0: i32, %arg1: memref<64x8xf32, #tpu.memory_space<vmem>>, %arg2: memref<144x128xf32, #tpu.memory_space<vmem>>, %arg3: memref<8x128xf32, #tpu.memory_space<vmem>>, %arg4: memref<64x128xf32, #tpu.memory_space<vmem>>, %arg5: memref<64x32xf32, #tpu.memory_space<vmem>>) attributes {dimension_semantics = [#tpu.dimension_semantics<arbitrary>], iteration_bounds = array<i64: 1>, scalar_prefetch = 0 : i64, scratch_operands = 2 : i64, tpu.core_type = #tpu.core_type<tc>, window_params = [{pipeline_mode = #tpu.pipeline_mode<synchronous>, transform_indices = @transform_0, window_bounds = array<i64: 64, 8>}, {pipeline_mode = #tpu.pipeline_mode<synchronous>, transform_indices = @transform_1, window_bounds = array<i64: 144, 128>}, {pipeline_mode = #tpu.pipeline_mode<synchronous>, transform_indices = @transform_2, window_bounds = array<i64: 8, 128>}]} {
    %c139 = arith.constant 139 : index
    %c0 = arith.constant 0 : index
    %0 = vector.load %arg2[%c139, %c0] : memref<144x128xf32, #tpu.memory_space<vmem>>, vector<1x128xf32>
    %1 = vector.shape_cast %0 : vector<1x128xf32> to vector<1x128xf32>
    %2 = vector.broadcast %1 : vector<1x128xf32> to vector<8x128xf32>
    %c140 = arith.constant 140 : index
    %c0_0 = arith.constant 0 : index
    %3 = vector.load %arg2[%c140, %c0_0] : memref<144x128xf32, #tpu.memory_space<vmem>>, vector<1x128xf32>
    %4 = vector.shape_cast %3 : vector<1x128xf32> to vector<1x128xf32>
    %5 = vector.broadcast %4 : vector<1x128xf32> to vector<8x128xf32>
    %c136 = arith.constant 136 : index
    %c0_1 = arith.constant 0 : index
    %6 = vector.load %arg2[%c136, %c0_1] : memref<144x128xf32, #tpu.memory_space<vmem>>, vector<1x128xf32>
    %c0_2 = arith.constant 0 : index
    %c0_3 = arith.constant 0 : index
    %7 = vector.load %arg2[%c0_2, %c0_3] : memref<144x128xf32, #tpu.memory_space<vmem>>, vector<8x128xf32>
    %c0_4 = arith.constant 0 : index
    %c0_5 = arith.constant 0 : index
    %8 = vector.load %arg1[%c0_4, %c0_5] : memref<64x8xf32, #tpu.memory_space<vmem>>, vector<64x8xf32>
    %cst = arith.constant dense<0.000000e+00> : vector<64x128xf32>
    %9 = tpu.matmul %8, %7, %cst {dimension_numbers = #tpu.dot_dimension_numbers<[1], [0], [0], [1], [0, 0, 1, 1], [], []>} : vector<64x8xf32>, vector<8x128xf32>, vector<64x128xf32> -> vector<64x128xf32>
    %10 = vector.broadcast %6 : vector<1x128xf32> to vector<64x128xf32>
    %11 = arith.addf %9, %10 : vector<64x128xf32>
    %c0_6 = arith.constant 0 : index
    %c0_7 = arith.constant 0 : index
    %12 = vector.load %arg4[%c0_6, %c0_7] : memref<64x128xf32, #tpu.memory_space<vmem>>, vector<64x128xf32>
    tpu.vector_store %arg4[%c0_6, %c0_7], %11 {strides = array<i32>} : memref<64x128xf32, #tpu.memory_space<vmem>>, vector<64x128xf32>,
    %c40 = arith.constant 40 : index
    %c0_8 = arith.constant 0 : index
    %13 = vector.load %arg2[%c40, %c0_8] : memref<144x128xf32, #tpu.memory_space<vmem>>, vector<32x128xf32>
    %cst_9 = arith.constant 0.000000e+00 : f32
    %14 = vector.broadcast %cst_9 : f32 to vector<8x32xf32>
    %cst_10 = arith.constant 0.000000e+00 : f32
    %15 = vector.broadcast %cst_10 : f32 to vector<8x32xf32>
    %c0_11 = arith.constant 0 : index
    %c0_12 = arith.constant 0 : index
    %16 = vector.load %arg4[%c0_11, %c0_12] : memref<64x128xf32, #tpu.memory_space<vmem>>, vector<8x128xf32>
    %cst_13 = arith.constant dense<0.000000e+00> : vector<8x128xf32>
    %17 = tpu.matmul %14, %13, %cst_13 {dimension_numbers = #tpu.dot_dimension_numbers<[1], [0], [0], [1], [0, 0, 1, 1], [], []>} : vector<8x32xf32>, vector<32x128xf32>, vector<8x128xf32> -> vector<8x128xf32>
    %18 = arith.addf %16, %17 : vector<8x128xf32>
    %19 = math.tanh %18 : vector<8x128xf32>
    %20 = arith.mulf %19, %2 : vector<8x128xf32>
    %21 = arith.addf %20, %5 : vector<8x128xf32>
    %22 = vector.extract_strided_slice %21 {offsets = [0, 0], sizes = [8, 32], strides = [1, 1]} : vector<8x128xf32> to vector<8x32xf32>
    %23 = vector.extract_strided_slice %21 {offsets = [0, 32], sizes = [8, 32], strides = [1, 1]} : vector<8x128xf32> to vector<8x32xf32>
    %24 = vector.extract_strided_slice %21 {offsets = [0, 64], sizes = [8, 32], strides = [1, 1]} : vector<8x128xf32> to vector<8x32xf32>
    %25 = vector.extract_strided_slice %21 {offsets = [0, 96], sizes = [8, 32], strides = [1, 1]} : vector<8x128xf32> to vector<8x32xf32>
    %26 = arith.mulf %23, %15 : vector<8x32xf32>
    %27 = arith.mulf %22, %24 : vector<8x32xf32>
    %28 = arith.addf %26, %27 : vector<8x32xf32>
    %29 = math.tanh %28 : vector<8x32xf32>
    %30 = arith.mulf %25, %29 : vector<8x32xf32>
    %c0_14 = arith.constant 0 : index
    %c0_15 = arith.constant 0 : index
    %31 = vector.load %arg5[%c0_14, %c0_15] : memref<64x32xf32, #tpu.memory_space<vmem>>, vector<8x32xf32>
    tpu.vector_store %arg5[%c0_14, %c0_15], %30 {strides = array<i32>} : memref<64x32xf32, #tpu.memory_space<vmem>>, vector<8x32xf32>,
    %c8 = arith.constant 8 : index
    %c0_16 = arith.constant 0 : index
    %32 = vector.load %arg4[%c8, %c0_16] : memref<64x128xf32, #tpu.memory_space<vmem>>, vector<8x128xf32>
    %cst_17 = arith.constant dense<0.000000e+00> : vector<8x128xf32>
    %33 = tpu.matmul %30, %13, %cst_17 {dimension_numbers = #tpu.dot_dimension_numbers<[1], [0], [0], [1], [0, 0, 1, 1], [], []>} : vector<8x32xf32>, vector<32x128xf32>, vector<8x128xf32> -> vector<8x128xf32>
    %34 = arith.addf %32, %33 : vector<8x128xf32>
    %35 = math.tanh %34 : vector<8x128xf32>
    %36 = arith.mulf %35, %2 : vector<8x128xf32>
    %37 = arith.addf %36, %5 : vector<8x128xf32>
    %38 = vector.extract_strided_slice %37 {offsets = [0, 0], sizes = [8, 32], strides = [1, 1]} : vector<8x128xf32> to vector<8x32xf32>
    %39 = vector.extract_strided_slice %37 {offsets = [0, 32], sizes = [8, 32], strides = [1, 1]} : vector<8x128xf32> to vector<8x32xf32>
    %40 = vector.extract_strided_slice %37 {offsets = [0, 64], sizes = [8, 32], strides = [1, 1]} : vector<8x128xf32> to vector<8x32xf32>
    %41 = vector.extract_strided_slice %37 {offsets = [0, 96], sizes = [8, 32], strides = [1, 1]} : vector<8x128xf32> to vector<8x32xf32>
    %42 = arith.mulf %39, %28 : vector<8x32xf32>
    %43 = arith.mulf %38, %40 : vector<8x32xf32>
    %44 = arith.addf %42, %43 : vector<8x32xf32>
    %45 = math.tanh %44 : vector<8x32xf32>
    %46 = arith.mulf %41, %45 : vector<8x32xf32>
    %c8_18 = arith.constant 8 : index
    %c0_19 = arith.constant 0 : index
    %47 = vector.load %arg5[%c8_18, %c0_19] : memref<64x32xf32, #tpu.memory_space<vmem>>, vector<8x32xf32>
    tpu.vector_store %arg5[%c8_18, %c0_19], %46 {strides = array<i32>} : memref<64x32xf32, #tpu.memory_space<vmem>>, vector<8x32xf32>,
    %c16 = arith.constant 16 : index
    %c0_20 = arith.constant 0 : index
    %48 = vector.load %arg4[%c16, %c0_20] : memref<64x128xf32, #tpu.memory_space<vmem>>, vector<8x128xf32>
    %cst_21 = arith.constant dense<0.000000e+00> : vector<8x128xf32>
    %49 = tpu.matmul %46, %13, %cst_21 {dimension_numbers = #tpu.dot_dimension_numbers<[1], [0], [0], [1], [0, 0, 1, 1], [], []>} : vector<8x32xf32>, vector<32x128xf32>, vector<8x128xf32> -> vector<8x128xf32>
    %50 = arith.addf %48, %49 : vector<8x128xf32>
    %51 = math.tanh %50 : vector<8x128xf32>
    %52 = arith.mulf %51, %2 : vector<8x128xf32>
    %53 = arith.addf %52, %5 : vector<8x128xf32>
    %54 = vector.extract_strided_slice %53 {offsets = [0, 0], sizes = [8, 32], strides = [1, 1]} : vector<8x128xf32> to vector<8x32xf32>
    %55 = vector.extract_strided_slice %53 {offsets = [0, 32], sizes = [8, 32], strides = [1, 1]} : vector<8x128xf32> to vector<8x32xf32>
    %56 = vector.extract_strided_slice %53 {offsets = [0, 64], sizes = [8, 32], strides = [1, 1]} : vector<8x128xf32> to vector<8x32xf32>
    %57 = vector.extract_strided_slice %53 {offsets = [0, 96], sizes = [8, 32], strides = [1, 1]} : vector<8x128xf32> to vector<8x32xf32>
    %58 = arith.mulf %55, %44 : vector<8x32xf32>
    %59 = arith.mulf %54, %56 : vector<8x32xf32>
    %60 = arith.addf %58, %59 : vector<8x32xf32>
    %61 = math.tanh %60 : vector<8x32xf32>
    %62 = arith.mulf %57, %61 : vector<8x32xf32>
    %c16_22 = arith.constant 16 : index
    %c0_23 = arith.constant 0 : index
    %63 = vector.load %arg5[%c16_22, %c0_23] : memref<64x32xf32, #tpu.memory_space<vmem>>, vector<8x32xf32>
    tpu.vector_store %arg5[%c16_22, %c0_23], %62 {strides = array<i32>} : memref<64x32xf32, #tpu.memory_space<vmem>>, vector<8x32xf32>,
    %c24 = arith.constant 24 : index
    %c0_24 = arith.constant 0 : index
    %64 = vector.load %arg4[%c24, %c0_24] : memref<64x128xf32, #tpu.memory_space<vmem>>, vector<8x128xf32>
    %cst_25 = arith.constant dense<0.000000e+00> : vector<8x128xf32>
    %65 = tpu.matmul %62, %13, %cst_25 {dimension_numbers = #tpu.dot_dimension_numbers<[1], [0], [0], [1], [0, 0, 1, 1], [], []>} : vector<8x32xf32>, vector<32x128xf32>, vector<8x128xf32> -> vector<8x128xf32>
    %66 = arith.addf %64, %65 : vector<8x128xf32>
    %67 = math.tanh %66 : vector<8x128xf32>
    %68 = arith.mulf %67, %2 : vector<8x128xf32>
    %69 = arith.addf %68, %5 : vector<8x128xf32>
    %70 = vector.extract_strided_slice %69 {offsets = [0, 0], sizes = [8, 32], strides = [1, 1]} : vector<8x128xf32> to vector<8x32xf32>
    %71 = vector.extract_strided_slice %69 {offsets = [0, 32], sizes = [8, 32], strides = [1, 1]} : vector<8x128xf32> to vector<8x32xf32>
    %72 = vector.extract_strided_slice %69 {offsets = [0, 64], sizes = [8, 32], strides = [1, 1]} : vector<8x128xf32> to vector<8x32xf32>
    %73 = vector.extract_strided_slice %69 {offsets = [0, 96], sizes = [8, 32], strides = [1, 1]} : vector<8x128xf32> to vector<8x32xf32>
    %74 = arith.mulf %71, %60 : vector<8x32xf32>
    %75 = arith.mulf %70, %72 : vector<8x32xf32>
    %76 = arith.addf %74, %75 : vector<8x32xf32>
    %77 = math.tanh %76 : vector<8x32xf32>
    %78 = arith.mulf %73, %77 : vector<8x32xf32>
    %c24_26 = arith.constant 24 : index
    %c0_27 = arith.constant 0 : index
    %79 = vector.load %arg5[%c24_26, %c0_27] : memref<64x32xf32, #tpu.memory_space<vmem>>, vector<8x32xf32>
    tpu.vector_store %arg5[%c24_26, %c0_27], %78 {strides = array<i32>} : memref<64x32xf32, #tpu.memory_space<vmem>>, vector<8x32xf32>,
    %c32 = arith.constant 32 : index
    %c0_28 = arith.constant 0 : index
    %80 = vector.load %arg4[%c32, %c0_28] : memref<64x128xf32, #tpu.memory_space<vmem>>, vector<8x128xf32>
    %cst_29 = arith.constant dense<0.000000e+00> : vector<8x128xf32>
    %81 = tpu.matmul %78, %13, %cst_29 {dimension_numbers = #tpu.dot_dimension_numbers<[1], [0], [0], [1], [0, 0, 1, 1], [], []>} : vector<8x32xf32>, vector<32x128xf32>, vector<8x128xf32> -> vector<8x128xf32>
    %82 = arith.addf %80, %81 : vector<8x128xf32>
    %83 = math.tanh %82 : vector<8x128xf32>
    %84 = arith.mulf %83, %2 : vector<8x128xf32>
    %85 = arith.addf %84, %5 : vector<8x128xf32>
    %86 = vector.extract_strided_slice %85 {offsets = [0, 0], sizes = [8, 32], strides = [1, 1]} : vector<8x128xf32> to vector<8x32xf32>
    %87 = vector.extract_strided_slice %85 {offsets = [0, 32], sizes = [8, 32], strides = [1, 1]} : vector<8x128xf32> to vector<8x32xf32>
    %88 = vector.extract_strided_slice %85 {offsets = [0, 64], sizes = [8, 32], strides = [1, 1]} : vector<8x128xf32> to vector<8x32xf32>
    %89 = vector.extract_strided_slice %85 {offsets = [0, 96], sizes = [8, 32], strides = [1, 1]} : vector<8x128xf32> to vector<8x32xf32>
    %90 = arith.mulf %87, %76 : vector<8x32xf32>
    %91 = arith.mulf %86, %88 : vector<8x32xf32>
    %92 = arith.addf %90, %91 : vector<8x32xf32>
    %93 = math.tanh %92 : vector<8x32xf32>
    %94 = arith.mulf %89, %93 : vector<8x32xf32>
    %c32_30 = arith.constant 32 : index
    %c0_31 = arith.constant 0 : index
    %95 = vector.load %arg5[%c32_30, %c0_31] : memref<64x32xf32, #tpu.memory_space<vmem>>, vector<8x32xf32>
    tpu.vector_store %arg5[%c32_30, %c0_31], %94 {strides = array<i32>} : memref<64x32xf32, #tpu.memory_space<vmem>>, vector<8x32xf32>,
    %c40_32 = arith.constant 40 : index
    %c0_33 = arith.constant 0 : index
    %96 = vector.load %arg4[%c40_32, %c0_33] : memref<64x128xf32, #tpu.memory_space<vmem>>, vector<8x128xf32>
    %cst_34 = arith.constant dense<0.000000e+00> : vector<8x128xf32>
    %97 = tpu.matmul %94, %13, %cst_34 {dimension_numbers = #tpu.dot_dimension_numbers<[1], [0], [0], [1], [0, 0, 1, 1], [], []>} : vector<8x32xf32>, vector<32x128xf32>, vector<8x128xf32> -> vector<8x128xf32>
    %98 = arith.addf %96, %97 : vector<8x128xf32>
    %99 = math.tanh %98 : vector<8x128xf32>
    %100 = arith.mulf %99, %2 : vector<8x128xf32>
    %101 = arith.addf %100, %5 : vector<8x128xf32>
    %102 = vector.extract_strided_slice %101 {offsets = [0, 0], sizes = [8, 32], strides = [1, 1]} : vector<8x128xf32> to vector<8x32xf32>
    %103 = vector.extract_strided_slice %101 {offsets = [0, 32], sizes = [8, 32], strides = [1, 1]} : vector<8x128xf32> to vector<8x32xf32>
    %104 = vector.extract_strided_slice %101 {offsets = [0, 64], sizes = [8, 32], strides = [1, 1]} : vector<8x128xf32> to vector<8x32xf32>
    %105 = vector.extract_strided_slice %101 {offsets = [0, 96], sizes = [8, 32], strides = [1, 1]} : vector<8x128xf32> to vector<8x32xf32>
    %106 = arith.mulf %103, %92 : vector<8x32xf32>
    %107 = arith.mulf %102, %104 : vector<8x32xf32>
    %108 = arith.addf %106, %107 : vector<8x32xf32>
    %109 = math.tanh %108 : vector<8x32xf32>
    %110 = arith.mulf %105, %109 : vector<8x32xf32>
    %c40_35 = arith.constant 40 : index
    %c0_36 = arith.constant 0 : index
    %111 = vector.load %arg5[%c40_35, %c0_36] : memref<64x32xf32, #tpu.memory_space<vmem>>, vector<8x32xf32>
    tpu.vector_store %arg5[%c40_35, %c0_36], %110 {strides = array<i32>} : memref<64x32xf32, #tpu.memory_space<vmem>>, vector<8x32xf32>,
    %c48 = arith.constant 48 : index
    %c0_37 = arith.constant 0 : index
    %112 = vector.load %arg4[%c48, %c0_37] : memref<64x128xf32, #tpu.memory_space<vmem>>, vector<8x128xf32>
    %cst_38 = arith.constant dense<0.000000e+00> : vector<8x128xf32>
    %113 = tpu.matmul %110, %13, %cst_38 {dimension_numbers = #tpu.dot_dimension_numbers<[1], [0], [0], [1], [0, 0, 1, 1], [], []>} : vector<8x32xf32>, vector<32x128xf32>, vector<8x128xf32> -> vector<8x128xf32>
    %114 = arith.addf %112, %113 : vector<8x128xf32>
    %115 = math.tanh %114 : vector<8x128xf32>
    %116 = arith.mulf %115, %2 : vector<8x128xf32>
    %117 = arith.addf %116, %5 : vector<8x128xf32>
    %118 = vector.extract_strided_slice %117 {offsets = [0, 0], sizes = [8, 32], strides = [1, 1]} : vector<8x128xf32> to vector<8x32xf32>
    %119 = vector.extract_strided_slice %117 {offsets = [0, 32], sizes = [8, 32], strides = [1, 1]} : vector<8x128xf32> to vector<8x32xf32>
    %120 = vector.extract_strided_slice %117 {offsets = [0, 64], sizes = [8, 32], strides = [1, 1]} : vector<8x128xf32> to vector<8x32xf32>
    %121 = vector.extract_strided_slice %117 {offsets = [0, 96], sizes = [8, 32], strides = [1, 1]} : vector<8x128xf32> to vector<8x32xf32>
    %122 = arith.mulf %119, %108 : vector<8x32xf32>
    %123 = arith.mulf %118, %120 : vector<8x32xf32>
    %124 = arith.addf %122, %123 : vector<8x32xf32>
    %125 = math.tanh %124 : vector<8x32xf32>
    %126 = arith.mulf %121, %125 : vector<8x32xf32>
    %c48_39 = arith.constant 48 : index
    %c0_40 = arith.constant 0 : index
    %127 = vector.load %arg5[%c48_39, %c0_40] : memref<64x32xf32, #tpu.memory_space<vmem>>, vector<8x32xf32>
    tpu.vector_store %arg5[%c48_39, %c0_40], %126 {strides = array<i32>} : memref<64x32xf32, #tpu.memory_space<vmem>>, vector<8x32xf32>,
    %c56 = arith.constant 56 : index
    %c0_41 = arith.constant 0 : index
    %128 = vector.load %arg4[%c56, %c0_41] : memref<64x128xf32, #tpu.memory_space<vmem>>, vector<8x128xf32>
    %cst_42 = arith.constant dense<0.000000e+00> : vector<8x128xf32>
    %129 = tpu.matmul %126, %13, %cst_42 {dimension_numbers = #tpu.dot_dimension_numbers<[1], [0], [0], [1], [0, 0, 1, 1], [], []>} : vector<8x32xf32>, vector<32x128xf32>, vector<8x128xf32> -> vector<8x128xf32>
    %130 = arith.addf %128, %129 : vector<8x128xf32>
    %131 = math.tanh %130 : vector<8x128xf32>
    %132 = arith.mulf %131, %2 : vector<8x128xf32>
    %133 = arith.addf %132, %5 : vector<8x128xf32>
    %134 = vector.extract_strided_slice %133 {offsets = [0, 0], sizes = [8, 32], strides = [1, 1]} : vector<8x128xf32> to vector<8x32xf32>
    %135 = vector.extract_strided_slice %133 {offsets = [0, 32], sizes = [8, 32], strides = [1, 1]} : vector<8x128xf32> to vector<8x32xf32>
    %136 = vector.extract_strided_slice %133 {offsets = [0, 64], sizes = [8, 32], strides = [1, 1]} : vector<8x128xf32> to vector<8x32xf32>
    %137 = vector.extract_strided_slice %133 {offsets = [0, 96], sizes = [8, 32], strides = [1, 1]} : vector<8x128xf32> to vector<8x32xf32>
    %138 = arith.mulf %135, %124 : vector<8x32xf32>
    %139 = arith.mulf %134, %136 : vector<8x32xf32>
    %140 = arith.addf %138, %139 : vector<8x32xf32>
    %141 = math.tanh %140 : vector<8x32xf32>
    %142 = arith.mulf %137, %141 : vector<8x32xf32>
    %c56_43 = arith.constant 56 : index
    %c0_44 = arith.constant 0 : index
    %143 = vector.load %arg5[%c56_43, %c0_44] : memref<64x32xf32, #tpu.memory_space<vmem>>, vector<8x32xf32>
    tpu.vector_store %arg5[%c56_43, %c0_44], %142 {strides = array<i32>} : memref<64x32xf32, #tpu.memory_space<vmem>>, vector<8x32xf32>,
    %c137 = arith.constant 137 : index
    %c0_45 = arith.constant 0 : index
    %144 = vector.load %arg2[%c137, %c0_45] : memref<144x128xf32, #tpu.memory_space<vmem>>, vector<1x128xf32>
    %c8_46 = arith.constant 8 : index
    %c0_47 = arith.constant 0 : index
    %145 = vector.load %arg2[%c8_46, %c0_47] : memref<144x128xf32, #tpu.memory_space<vmem>>, vector<32x128xf32>
    %c0_48 = arith.constant 0 : index
    %c0_49 = arith.constant 0 : index
    %146 = vector.load %arg5[%c0_48, %c0_49] : memref<64x32xf32, #tpu.memory_space<vmem>>, vector<64x32xf32>
    %cst_50 = arith.constant dense<0.000000e+00> : vector<64x128xf32>
    %147 = tpu.matmul %146, %145, %cst_50 {dimension_numbers = #tpu.dot_dimension_numbers<[1], [0], [0], [1], [0, 0, 1, 1], [], []>} : vector<64x32xf32>, vector<32x128xf32>, vector<64x128xf32> -> vector<64x128xf32>
    %148 = vector.broadcast %144 : vector<1x128xf32> to vector<64x128xf32>
    %149 = arith.addf %147, %148 : vector<64x128xf32>
    %c0_51 = arith.constant 0 : index
    %c0_52 = arith.constant 0 : index
    %150 = vector.load %arg4[%c0_51, %c0_52] : memref<64x128xf32, #tpu.memory_space<vmem>>, vector<64x128xf32>
    tpu.vector_store %arg4[%c0_51, %c0_52], %149 {strides = array<i32>} : memref<64x128xf32, #tpu.memory_space<vmem>>, vector<64x128xf32>,
    %c72 = arith.constant 72 : index
    %c0_53 = arith.constant 0 : index
    %151 = vector.load %arg2[%c72, %c0_53] : memref<144x128xf32, #tpu.memory_space<vmem>>, vector<32x128xf32>
    %cst_54 = arith.constant 0.000000e+00 : f32
    %152 = vector.broadcast %cst_54 : f32 to vector<8x32xf32>
    %cst_55 = arith.constant 0.000000e+00 : f32
    %153 = vector.broadcast %cst_55 : f32 to vector<8x32xf32>
    %c0_56 = arith.constant 0 : index
    %c0_57 = arith.constant 0 : index
    %154 = vector.load %arg4[%c0_56, %c0_57] : memref<64x128xf32, #tpu.memory_space<vmem>>, vector<8x128xf32>
    %cst_58 = arith.constant dense<0.000000e+00> : vector<8x128xf32>
    %155 = tpu.matmul %152, %151, %cst_58 {dimension_numbers = #tpu.dot_dimension_numbers<[1], [0], [0], [1], [0, 0, 1, 1], [], []>} : vector<8x32xf32>, vector<32x128xf32>, vector<8x128xf32> -> vector<8x128xf32>
    %156 = arith.addf %154, %155 : vector<8x128xf32>
    %157 = math.tanh %156 : vector<8x128xf32>
    %158 = arith.mulf %157, %2 : vector<8x128xf32>
    %159 = arith.addf %158, %5 : vector<8x128xf32>
    %160 = vector.extract_strided_slice %159 {offsets = [0, 0], sizes = [8, 32], strides = [1, 1]} : vector<8x128xf32> to vector<8x32xf32>
    %161 = vector.extract_strided_slice %159 {offsets = [0, 32], sizes = [8, 32], strides = [1, 1]} : vector<8x128xf32> to vector<8x32xf32>
    %162 = vector.extract_strided_slice %159 {offsets = [0, 64], sizes = [8, 32], strides = [1, 1]} : vector<8x128xf32> to vector<8x32xf32>
    %163 = vector.extract_strided_slice %159 {offsets = [0, 96], sizes = [8, 32], strides = [1, 1]} : vector<8x128xf32> to vector<8x32xf32>
    %164 = arith.mulf %161, %153 : vector<8x32xf32>
    %165 = arith.mulf %160, %162 : vector<8x32xf32>
    %166 = arith.addf %164, %165 : vector<8x32xf32>
    %167 = math.tanh %166 : vector<8x32xf32>
    %168 = arith.mulf %163, %167 : vector<8x32xf32>
    %c8_59 = arith.constant 8 : index
    %c0_60 = arith.constant 0 : index
    %169 = vector.load %arg4[%c8_59, %c0_60] : memref<64x128xf32, #tpu.memory_space<vmem>>, vector<8x128xf32>
    %cst_61 = arith.constant dense<0.000000e+00> : vector<8x128xf32>
    %170 = tpu.matmul %168, %151, %cst_61 {dimension_numbers = #tpu.dot_dimension_numbers<[1], [0], [0], [1], [0, 0, 1, 1], [], []>} : vector<8x32xf32>, vector<32x128xf32>, vector<8x128xf32> -> vector<8x128xf32>
    %171 = arith.addf %169, %170 : vector<8x128xf32>
    %172 = math.tanh %171 : vector<8x128xf32>
    %173 = arith.mulf %172, %2 : vector<8x128xf32>
    %174 = arith.addf %173, %5 : vector<8x128xf32>
    %175 = vector.extract_strided_slice %174 {offsets = [0, 0], sizes = [8, 32], strides = [1, 1]} : vector<8x128xf32> to vector<8x32xf32>
    %176 = vector.extract_strided_slice %174 {offsets = [0, 32], sizes = [8, 32], strides = [1, 1]} : vector<8x128xf32> to vector<8x32xf32>
    %177 = vector.extract_strided_slice %174 {offsets = [0, 64], sizes = [8, 32], strides = [1, 1]} : vector<8x128xf32> to vector<8x32xf32>
    %178 = vector.extract_strided_slice %174 {offsets = [0, 96], sizes = [8, 32], strides = [1, 1]} : vector<8x128xf32> to vector<8x32xf32>
    %179 = arith.mulf %176, %166 : vector<8x32xf32>
    %180 = arith.mulf %175, %177 : vector<8x32xf32>
    %181 = arith.addf %179, %180 : vector<8x32xf32>
    %182 = math.tanh %181 : vector<8x32xf32>
    %183 = arith.mulf %178, %182 : vector<8x32xf32>
    %c16_62 = arith.constant 16 : index
    %c0_63 = arith.constant 0 : index
    %184 = vector.load %arg4[%c16_62, %c0_63] : memref<64x128xf32, #tpu.memory_space<vmem>>, vector<8x128xf32>
    %cst_64 = arith.constant dense<0.000000e+00> : vector<8x128xf32>
    %185 = tpu.matmul %183, %151, %cst_64 {dimension_numbers = #tpu.dot_dimension_numbers<[1], [0], [0], [1], [0, 0, 1, 1], [], []>} : vector<8x32xf32>, vector<32x128xf32>, vector<8x128xf32> -> vector<8x128xf32>
    %186 = arith.addf %184, %185 : vector<8x128xf32>
    %187 = math.tanh %186 : vector<8x128xf32>
    %188 = arith.mulf %187, %2 : vector<8x128xf32>
    %189 = arith.addf %188, %5 : vector<8x128xf32>
    %190 = vector.extract_strided_slice %189 {offsets = [0, 0], sizes = [8, 32], strides = [1, 1]} : vector<8x128xf32> to vector<8x32xf32>
    %191 = vector.extract_strided_slice %189 {offsets = [0, 32], sizes = [8, 32], strides = [1, 1]} : vector<8x128xf32> to vector<8x32xf32>
    %192 = vector.extract_strided_slice %189 {offsets = [0, 64], sizes = [8, 32], strides = [1, 1]} : vector<8x128xf32> to vector<8x32xf32>
    %193 = vector.extract_strided_slice %189 {offsets = [0, 96], sizes = [8, 32], strides = [1, 1]} : vector<8x128xf32> to vector<8x32xf32>
    %194 = arith.mulf %191, %181 : vector<8x32xf32>
    %195 = arith.mulf %190, %192 : vector<8x32xf32>
    %196 = arith.addf %194, %195 : vector<8x32xf32>
    %197 = math.tanh %196 : vector<8x32xf32>
    %198 = arith.mulf %193, %197 : vector<8x32xf32>
    %c24_65 = arith.constant 24 : index
    %c0_66 = arith.constant 0 : index
    %199 = vector.load %arg4[%c24_65, %c0_66] : memref<64x128xf32, #tpu.memory_space<vmem>>, vector<8x128xf32>
    %cst_67 = arith.constant dense<0.000000e+00> : vector<8x128xf32>
    %200 = tpu.matmul %198, %151, %cst_67 {dimension_numbers = #tpu.dot_dimension_numbers<[1], [0], [0], [1], [0, 0, 1, 1], [], []>} : vector<8x32xf32>, vector<32x128xf32>, vector<8x128xf32> -> vector<8x128xf32>
    %201 = arith.addf %199, %200 : vector<8x128xf32>
    %202 = math.tanh %201 : vector<8x128xf32>
    %203 = arith.mulf %202, %2 : vector<8x128xf32>
    %204 = arith.addf %203, %5 : vector<8x128xf32>
    %205 = vector.extract_strided_slice %204 {offsets = [0, 0], sizes = [8, 32], strides = [1, 1]} : vector<8x128xf32> to vector<8x32xf32>
    %206 = vector.extract_strided_slice %204 {offsets = [0, 32], sizes = [8, 32], strides = [1, 1]} : vector<8x128xf32> to vector<8x32xf32>
    %207 = vector.extract_strided_slice %204 {offsets = [0, 64], sizes = [8, 32], strides = [1, 1]} : vector<8x128xf32> to vector<8x32xf32>
    %208 = vector.extract_strided_slice %204 {offsets = [0, 96], sizes = [8, 32], strides = [1, 1]} : vector<8x128xf32> to vector<8x32xf32>
    %209 = arith.mulf %206, %196 : vector<8x32xf32>
    %210 = arith.mulf %205, %207 : vector<8x32xf32>
    %211 = arith.addf %209, %210 : vector<8x32xf32>
    %212 = math.tanh %211 : vector<8x32xf32>
    %213 = arith.mulf %208, %212 : vector<8x32xf32>
    %c32_68 = arith.constant 32 : index
    %c0_69 = arith.constant 0 : index
    %214 = vector.load %arg4[%c32_68, %c0_69] : memref<64x128xf32, #tpu.memory_space<vmem>>, vector<8x128xf32>
    %cst_70 = arith.constant dense<0.000000e+00> : vector<8x128xf32>
    %215 = tpu.matmul %213, %151, %cst_70 {dimension_numbers = #tpu.dot_dimension_numbers<[1], [0], [0], [1], [0, 0, 1, 1], [], []>} : vector<8x32xf32>, vector<32x128xf32>, vector<8x128xf32> -> vector<8x128xf32>
    %216 = arith.addf %214, %215 : vector<8x128xf32>
    %217 = math.tanh %216 : vector<8x128xf32>
    %218 = arith.mulf %217, %2 : vector<8x128xf32>
    %219 = arith.addf %218, %5 : vector<8x128xf32>
    %220 = vector.extract_strided_slice %219 {offsets = [0, 0], sizes = [8, 32], strides = [1, 1]} : vector<8x128xf32> to vector<8x32xf32>
    %221 = vector.extract_strided_slice %219 {offsets = [0, 32], sizes = [8, 32], strides = [1, 1]} : vector<8x128xf32> to vector<8x32xf32>
    %222 = vector.extract_strided_slice %219 {offsets = [0, 64], sizes = [8, 32], strides = [1, 1]} : vector<8x128xf32> to vector<8x32xf32>
    %223 = vector.extract_strided_slice %219 {offsets = [0, 96], sizes = [8, 32], strides = [1, 1]} : vector<8x128xf32> to vector<8x32xf32>
    %224 = arith.mulf %221, %211 : vector<8x32xf32>
    %225 = arith.mulf %220, %222 : vector<8x32xf32>
    %226 = arith.addf %224, %225 : vector<8x32xf32>
    %227 = math.tanh %226 : vector<8x32xf32>
    %228 = arith.mulf %223, %227 : vector<8x32xf32>
    %c40_71 = arith.constant 40 : index
    %c0_72 = arith.constant 0 : index
    %229 = vector.load %arg4[%c40_71, %c0_72] : memref<64x128xf32, #tpu.memory_space<vmem>>, vector<8x128xf32>
    %cst_73 = arith.constant dense<0.000000e+00> : vector<8x128xf32>
    %230 = tpu.matmul %228, %151, %cst_73 {dimension_numbers = #tpu.dot_dimension_numbers<[1], [0], [0], [1], [0, 0, 1, 1], [], []>} : vector<8x32xf32>, vector<32x128xf32>, vector<8x128xf32> -> vector<8x128xf32>
    %231 = arith.addf %229, %230 : vector<8x128xf32>
    %232 = math.tanh %231 : vector<8x128xf32>
    %233 = arith.mulf %232, %2 : vector<8x128xf32>
    %234 = arith.addf %233, %5 : vector<8x128xf32>
    %235 = vector.extract_strided_slice %234 {offsets = [0, 0], sizes = [8, 32], strides = [1, 1]} : vector<8x128xf32> to vector<8x32xf32>
    %236 = vector.extract_strided_slice %234 {offsets = [0, 32], sizes = [8, 32], strides = [1, 1]} : vector<8x128xf32> to vector<8x32xf32>
    %237 = vector.extract_strided_slice %234 {offsets = [0, 64], sizes = [8, 32], strides = [1, 1]} : vector<8x128xf32> to vector<8x32xf32>
    %238 = vector.extract_strided_slice %234 {offsets = [0, 96], sizes = [8, 32], strides = [1, 1]} : vector<8x128xf32> to vector<8x32xf32>
    %239 = arith.mulf %236, %226 : vector<8x32xf32>
    %240 = arith.mulf %235, %237 : vector<8x32xf32>
    %241 = arith.addf %239, %240 : vector<8x32xf32>
    %242 = math.tanh %241 : vector<8x32xf32>
    %243 = arith.mulf %238, %242 : vector<8x32xf32>
    %c48_74 = arith.constant 48 : index
    %c0_75 = arith.constant 0 : index
    %244 = vector.load %arg4[%c48_74, %c0_75] : memref<64x128xf32, #tpu.memory_space<vmem>>, vector<8x128xf32>
    %cst_76 = arith.constant dense<0.000000e+00> : vector<8x128xf32>
    %245 = tpu.matmul %243, %151, %cst_76 {dimension_numbers = #tpu.dot_dimension_numbers<[1], [0], [0], [1], [0, 0, 1, 1], [], []>} : vector<8x32xf32>, vector<32x128xf32>, vector<8x128xf32> -> vector<8x128xf32>
    %246 = arith.addf %244, %245 : vector<8x128xf32>
    %247 = math.tanh %246 : vector<8x128xf32>
    %248 = arith.mulf %247, %2 : vector<8x128xf32>
    %249 = arith.addf %248, %5 : vector<8x128xf32>
    %250 = vector.extract_strided_slice %249 {offsets = [0, 0], sizes = [8, 32], strides = [1, 1]} : vector<8x128xf32> to vector<8x32xf32>
    %251 = vector.extract_strided_slice %249 {offsets = [0, 32], sizes = [8, 32], strides = [1, 1]} : vector<8x128xf32> to vector<8x32xf32>
    %252 = vector.extract_strided_slice %249 {offsets = [0, 64], sizes = [8, 32], strides = [1, 1]} : vector<8x128xf32> to vector<8x32xf32>
    %253 = vector.extract_strided_slice %249 {offsets = [0, 96], sizes = [8, 32], strides = [1, 1]} : vector<8x128xf32> to vector<8x32xf32>
    %254 = arith.mulf %251, %241 : vector<8x32xf32>
    %255 = arith.mulf %250, %252 : vector<8x32xf32>
    %256 = arith.addf %254, %255 : vector<8x32xf32>
    %257 = math.tanh %256 : vector<8x32xf32>
    %258 = arith.mulf %253, %257 : vector<8x32xf32>
    %c56_77 = arith.constant 56 : index
    %c0_78 = arith.constant 0 : index
    %259 = vector.load %arg4[%c56_77, %c0_78] : memref<64x128xf32, #tpu.memory_space<vmem>>, vector<8x128xf32>
    %cst_79 = arith.constant dense<0.000000e+00> : vector<8x128xf32>
    %260 = tpu.matmul %258, %151, %cst_79 {dimension_numbers = #tpu.dot_dimension_numbers<[1], [0], [0], [1], [0, 0, 1, 1], [], []>} : vector<8x32xf32>, vector<32x128xf32>, vector<8x128xf32> -> vector<8x128xf32>
    %261 = arith.addf %259, %260 : vector<8x128xf32>
    %262 = math.tanh %261 : vector<8x128xf32>
    %263 = arith.mulf %262, %2 : vector<8x128xf32>
    %264 = arith.addf %263, %5 : vector<8x128xf32>
    %265 = vector.extract_strided_slice %264 {offsets = [0, 0], sizes = [8, 32], strides = [1, 1]} : vector<8x128xf32> to vector<8x32xf32>
    %266 = vector.extract_strided_slice %264 {offsets = [0, 32], sizes = [8, 32], strides = [1, 1]} : vector<8x128xf32> to vector<8x32xf32>
    %267 = vector.extract_strided_slice %264 {offsets = [0, 64], sizes = [8, 32], strides = [1, 1]} : vector<8x128xf32> to vector<8x32xf32>
    %268 = vector.extract_strided_slice %264 {offsets = [0, 96], sizes = [8, 32], strides = [1, 1]} : vector<8x128xf32> to vector<8x32xf32>
    %269 = arith.mulf %266, %256 : vector<8x32xf32>
    %270 = arith.mulf %265, %267 : vector<8x32xf32>
    %271 = arith.addf %269, %270 : vector<8x32xf32>
    %272 = math.tanh %271 : vector<8x32xf32>
    %273 = arith.mulf %268, %272 : vector<8x32xf32>
    %c104 = arith.constant 104 : index
    %c0_80 = arith.constant 0 : index
    %274 = vector.load %arg2[%c104, %c0_80] : memref<144x128xf32, #tpu.memory_space<vmem>>, vector<32x128xf32>
    %c138 = arith.constant 138 : index
    %c0_81 = arith.constant 0 : index
    %275 = vector.load %arg2[%c138, %c0_81] : memref<144x128xf32, #tpu.memory_space<vmem>>, vector<1x128xf32>
    %cst_82 = arith.constant dense<0.000000e+00> : vector<8x128xf32>
    %276 = tpu.matmul %273, %274, %cst_82 {dimension_numbers = #tpu.dot_dimension_numbers<[1], [0], [0], [1], [0, 0, 1, 1], [], []>} : vector<8x32xf32>, vector<32x128xf32>, vector<8x128xf32> -> vector<8x128xf32>
    %277 = vector.broadcast %275 : vector<1x128xf32> to vector<8x128xf32>
    %278 = arith.addf %276, %277 : vector<8x128xf32>
    %c0_83 = arith.constant 0 : index
    %c0_84 = arith.constant 0 : index
    %279 = vector.load %arg3[%c0_83, %c0_84] : memref<8x128xf32, #tpu.memory_space<vmem>>, vector<8x128xf32>
    tpu.vector_store %arg3[%c0_83, %c0_84], %278 {strides = array<i32>} : memref<8x128xf32, #tpu.memory_space<vmem>>, vector<8x128xf32>,
    return
  }
  func.func @transform_0(%arg0: i32) -> (i32, i32) {
    %c0_i32 = arith.constant 0 : i32
    %c0_i32_0 = arith.constant 0 : i32
    %c0_i32_1 = arith.constant 0 : i32
    return %c0_i32, %c0_i32_0 : i32, i32
  }
  func.func @transform_1(%arg0: i32) -> (i32, i32) {
    %c0_i32 = arith.constant 0 : i32
    %c0_i32_0 = arith.constant 0 : i32
    %c0_i32_1 = arith.constant 0 : i32
    return %c0_i32, %c0_i32_0 : i32, i32
  }
  func.func @transform_2(%arg0: i32) -> (i32, i32) {
    %c0_i32 = arith.constant 0 : i32
    %c0_i32_0 = arith.constant 0 : i32
    %c0_i32_1 = arith.constant 0 : i32
    return %c0_i32, %c0_i32_0 : i32, i32
  }
}

</mosaic_0001>

<bundles_post_ra>
// kernel: tpu_custom_call.1
= control target key start
LH: loop header
LB: loop body
LE: loop exit
PB: predicated region body
PF: predicated region fallthrough
CT: control target
= control target key end

     0   :  { %7 = vsyncpa [#allocation5], 0  ;;  %s1488_s0 = inlined_call_operand.vmem [shape: f32[64,8], index: 0, kind: input, shape index: {}]   ;;  %s1489_s1 = inlined_call_operand.hbm [shape: f32[144,128], index: 1, kind: input, shape index: {}]   ;;  %s1490_s2 = inlined_call_operand.hbm [shape: f32[8,128], index: 2, kind: output, shape index: {}]  }
   0x1   :  { %8 = vsyncpa [#allocation6], 0  ;;  %s15_s11 = sshll.u32 %s1489_s1, 4  ;;  %s1185_s12 = smov [#allocation4]   ;;  %s16_s11 = int_to_ptr.hbm [resolvable:$true] %s15_s11 }
   0x2   :  { %s17_s13 = sshll.u32 %s1185_s12, 4  ;;  %s1186_s14 = smov 128   ;;  %s18_s13 = int_to_ptr.vmem [resolvable:$true] %s17_s13 }
   0x3   :  { %s1187_s15 = smov 8  }
   0x4   :  { %23 = dma.hbm_to_vmem [thread:$0]  %s16_s11, 2304, %s18_s13, [#allocation5], %s1186_s14, %s1186_s14, %s1187_s15  }
   0x5   :  { %1181 = dma.done.wait [#allocation5], 2304  }
   0x6   :  { %1182 = vsyncadd [#allocation5], 4294964992  ;;  %vm43_vm0 = vcmask 64512   ;;  %v1210_v0 = vld [vmem:[#allocation4 + $0x40] sm:$0xff]  ;;  %v1212_v1 = vld [vmem:[#allocation4 + $0x38] sm:$0xff]  ;;  %v1188_v6 = vmov 0.0  }
   0x7   :  { %v33_v2 = vld [vmem:[#allocation4] sm:$0xff]  ;;  %138 = vmatpush.msra.mxu1 %v1210_v0  ;;  %v1218_v4 = vld [vmem:[#allocation4 + $0x30] sm:$0xff]  ;;  %187 = vmatpush.msra.mxu2 %v1210_v0  ;;  %v1224_v5 = vld [vmem:[#allocation4 + $0x28] sm:$0xff]  ;;  %s1189_s17 = smov 64   ;;  %s1190_s18 = smov 32   ;;  %vm122_vm1 = vcmask 261120  }
   0x8   :  { %83 = vmatpush.msra.mxu0 %v33_v2  ;;  %v34_v3 = vld [vmem:[%s1488_s0] sm:$0xff]  ;;  %v1247_v7 = vld [vmem:[#allocation4 + $0x88] ss:$0 sm:$0xff]  ;;  %v1250_v12 = vld [vmem:[#allocation4 + $0x8b] ss:$0 sm:$0xff]  ;;  %s1016_s8 = sshll.u32 %s1490_s2, 4  ;;  %s1017_s8 = int_to_ptr.hbm [resolvable:$true] %s1016_s8 }
   0x9   :  { %1026 = vmatmul.msk.f32.vlgmr.msra.gmra.mxu0 %vm43_vm0, %v34_v3  ;;  %139 = vmatpush.msra.mxu1 %v1212_v1  ;;  %v1252_v13 = vld [vmem:[#allocation4 + $0x8c] ss:$0 sm:$0xff]  ;;  %v519_v25 = vld [vmem:[#allocation4 + $0x20] sm:$0xff]  ;;  %v518_v26 = vld [vmem:[#allocation4 + $0x18] sm:$0xff] }
   0xa   :  { %383 = vmatpush.msrb.mxu0 %v1210_v0  ;;  %188 = vmatpush.msra.mxu2 %v1212_v1  ;;  %v35_v27 = vld [vmem:[%s1488_s0 + $0x8] sm:$0xff]  ;;  %v517_v28 = vld [vmem:[#allocation4 + $0x10] sm:$0xff]  ;;  %v37_v63 = vld [vmem:[%s1488_s0 + $0x18] sm:$0xff] }
   0xb   :  { %140 = vmatpush.msra.mxu1 %v1218_v4  ;;  %565 = vmatpush.msra.mxu3 %v519_v25  ;;  %v516_v29 = vld [vmem:[#allocation4 + $0x8] sm:$0xff]  ;;  %v36_v47 = vld [vmem:[%s1488_s0 + $0x10] sm:$0xff] }
   0xc   :  { %384 = vmatpush.msrb.mxu0 %v1212_v1  ;;  %189 = vmatpush.msra.mxu2 %v1218_v4 }
   0xd   :  { %141 = vmatpush.msra.mxu1 %v1224_v5  ;;  %566 = vmatpush.msra.mxu3 %v518_v26 }
   0xe   :  { %385 = vmatpush.msrb.mxu0 %v1218_v4  ;;  %142 = vmatmul.f32.vlgmr.msra.gmra.mxu1 %v1188_v6 }
   0xf   :  { %190 = vmatpush.msra.mxu2 %v1224_v5  ;;  %285 = vmatpush.msrb.mxu1 %v1210_v0 }
  0x10   :  { %386 = vmatpush.msrb.mxu0 %v1224_v5  ;;  %567 = vmatpush.msra.mxu3 %v517_v28 }
  0x11   :  { %236 = vmatpush.msrb.mxu2 %v1210_v0  ;;  %286 = vmatpush.msrb.mxu1 %v1212_v1 }
  0x12   :  { %1027 = vmatmul.msk.f32.gmra.mxu0 %vm43_vm0, %v35_v27  ;;  %568 = vmatpush.msra.mxu3 %v516_v29 }
  0x13   :  { %237 = vmatpush.msrb.mxu2 %v1212_v1  ;;  %287 = vmatpush.msrb.mxu1 %v1218_v4 }
  0x15   :  { %238 = vmatpush.msrb.mxu2 %v1218_v4  ;;  %288 = vmatpush.msrb.mxu1 %v1224_v5 }
  0x17   :  { %239 = vmatpush.msrb.mxu2 %v1224_v5  ;;  %432 = vmatpush.msra.mxu1 %v1210_v0 }
  0x19   :  { %433 = vmatpush.msra.mxu1 %v1212_v1 }
  0x1a   :  { %1028 = vmatmul.msk.f32.gmra.mxu0 %vm43_vm0, %v36_v47 }
  0x1b   :  { %434 = vmatpush.msra.mxu1 %v1218_v4 }
  0x1d   :  { %435 = vmatpush.msra.mxu1 %v1224_v5 }
  0x22   :  { %1029 = vmatmul.msk.f32.gmra.mxu0 %vm43_vm0, %v37_v63  ;;  %v1348_v63 = vld [vmem:[#allocation4 + $0x60] sm:$0xff] }
  0x86   :  { %v85_v8 = vpop.f32.mrf.mxu0 }
  0x87   :  { %v86_v9 = vadd.f32 %v1247_v7, %v85_v8 }
  0x8b   :  { %v143_v10 = vpop.f32.mrf.mxu1 }
  0x8c   :  { %v146_v11 = vadd.f32 %v143_v10, %v86_v9 }
  0x8e   :  { %1069 = vtanh.f32 %v146_v11 }
  0x8f   :  { %v88_v32 = vpop.f32.mrf.mxu0 }
  0x90   :  { %v89_v33 = vadd.f32 %v1247_v7, %v88_v32 }
  0x94   :  { %v1070_v14 = vpop.eup %1069 }
  0x95   :  { %v148_v15 = vmul.f32 %v1070_v14, %v1250_v12 }
  0x97   :  { %v149_v16 = vadd.f32 %v1252_v13, %v148_v15  ;;  %v91_v50 = vpop.f32.mrf.mxu0 }
  0x98   :  { %v92_v51 = vadd.f32 %v1247_v7, %v91_v50 }
  0x99   :  { %152 = vrot.lane.b32.xlu0 %v149_v16, %s1189_s17  ;;  %v150_v19 = vmul.f32 0.0, %v149_v16 }
 0x10b   :  { %v153_v17 = vpop.permute.xlu0 %152 }
 0x10c   :  { %v155_v18 = vmul.f32 %v153_v17, %v149_v16 }
 0x10e   :  { %157 = vrot.lane.b32.xlu0 %v155_v18, %s1190_s18 }
 0x180   :  { %v158_v20 = vpop.permute.xlu0 %157 }
 0x181   :  { %v160_v21 = vadd.f32 %v158_v20, %v150_v19 }
 0x183   :  { %1071 = vtanh.f32 %v160_v21 }
 0x189   :  { %v1072_v22 = vpop.eup %1071 }
 0x18a   :  { %163 = vrot.lane.b32.xlu1 %v1072_v22, %s1189_s17 }
 0x1fc   :  { %v164_v23 = vpop.permute.xlu1 %163 }
 0x1fd   :  { %v166_v24 = vmul.f32 %v164_v23, %v149_v16  ;;  %v38_v23 = vld [vmem:[%s1488_s0 + $0x20] sm:$0xff] }
 0x1fe   :  { %1030 = vmatmul.msk.f32.gmra.mxu0 %vm43_vm0, %v38_v23 }
 0x1ff   :  { %168 = vrot.lane.b32.xlu1 %v166_v24, %s1190_s18 }
 0x271   :  { %v169_v30 = vpop.permute.xlu1 %168 }
 0x272   :  { %171 = vst.msk [vmem:[#allocation3] sm:$0xff] %vm122_vm1, %v169_v30  ;;  %1034 = vmatmul.msk.f32.vlgmr.msra.gmra.mxu2 %vm122_vm1, %v169_v30 }
 0x273   :  { %334 = vmatpush.msra.mxu2 %v1210_v0 }
 0x275   :  { %335 = vmatpush.msra.mxu2 %v1212_v1 }
 0x277   :  { %336 = vmatpush.msra.mxu2 %v1218_v4 }
 0x279   :  { %v520_v31 = vld [vmem:[#allocation3] sm:$0xff]  ;;  %337 = vmatpush.msra.mxu2 %v1224_v5 }
 0x27a   :  { %1041 = vmatmul.msk.f32.vlgmr.msra.gmra.mxu3 %vm122_vm1, %v520_v31 }
 0x2f5   :  { %v192_v34 = vpop.f32.mrf.mxu2 }
 0x2f6   :  { %v195_v35 = vadd.f32 %v192_v34, %v89_v33 }
 0x2f8   :  { %1073 = vtanh.f32 %v195_v35 }
 0x2fe   :  { %v1074_v36 = vpop.eup %1073 }
 0x2ff   :  { %v197_v37 = vmul.f32 %v1074_v36, %v1250_v12 }
 0x301   :  { %v198_v38 = vadd.f32 %v1252_v13, %v197_v37 }
 0x303   :  { %201 = vrot.lane.b32.xlu2 %v198_v38, %s1189_s17  ;;  %v199_v41 = vmul.f32 %v198_v38, %v160_v21 }
 0x35d   :  { %v202_v39 = vpop.permute.xlu2 %201 }
 0x35e   :  { %v204_v40 = vmul.f32 %v202_v39, %v198_v38  ;;  %v39_v39 = vld [vmem:[%s1488_s0 + $0x28] sm:$0xff] }
 0x35f   :  { %1031 = vmatmul.msk.f32.gmra.mxu0 %vm43_vm0, %v39_v39 }
 0x360   :  { %206 = vrot.lane.b32.xlu2 %v204_v40, %s1190_s18  ;;  %v40_v40 = vld [vmem:[%s1488_s0 + $0x30] sm:$0xff] }
 0x367   :  { %1032 = vmatmul.msk.f32.gmra.mxu0 %vm43_vm0, %v40_v40 }
 0x3ba   :  { %v207_v42 = vpop.permute.xlu2 %206 }
 0x3bb   :  { %v209_v43 = vadd.f32 %v207_v42, %v199_v41  ;;  %v41_v41 = vld [vmem:[%s1488_s0 + $0x38] sm:$0xff]  ;;  %s1191_s0 = smov [#allocation7]  }
 0x3bc   :  { %1033 = vmatmul.msk.f32.gmra.mxu0 %vm43_vm0, %v41_v41  ;;  %s1014_s5 = sshll.u32 %s1191_s0, 4  ;;  %s1015_s5 = int_to_ptr.vmem [resolvable:$true] %s1014_s5 }
 0x3bd   :  { %1075 = vtanh.f32 %v209_v43 }
 0x3c3   :  { %v1076_v44 = vpop.eup %1075 }
 0x3c4   :  { %212 = vrot.lane.b32.xlu0 %v1076_v44, %s1189_s17 }
 0x436   :  { %v213_v45 = vpop.permute.xlu0 %212 }
 0x437   :  { %v215_v46 = vmul.f32 %v213_v45, %v198_v38 }
 0x439   :  { %217 = vrot.lane.b32.xlu1 %v215_v46, %s1190_s18 }
 0x4ab   :  { %v218_v48 = vpop.permute.xlu1 %217 }
 0x4ac   :  { %220 = vst.msk [vmem:[#allocation3 + $0x8] sm:$0xff] %vm122_vm1, %v218_v48  ;;  %1035 = vmatmul.msk.f32.vlgmr.msrb.gmra.mxu2 %vm122_vm1, %v218_v48 }
 0x4ad   :  { %481 = vmatpush.msrb.mxu2 %v1210_v0 }
 0x4af   :  { %482 = vmatpush.msrb.mxu2 %v1212_v1 }
 0x4b1   :  { %483 = vmatpush.msrb.mxu2 %v1218_v4  ;;  %v94_v4 = vpop.f32.mrf.mxu0 }
 0x4b3   :  { %v521_v49 = vld [vmem:[#allocation3 + $0x8] sm:$0xff]  ;;  %484 = vmatpush.msrb.mxu2 %v1224_v5  ;;  %v95_v5 = vadd.f32 %v1247_v7, %v94_v4 }
 0x4b4   :  { %1042 = vmatmul.msk.f32.gmra.mxu3 %vm122_vm1, %v521_v49 }
 0x4b9   :  { %v97_v26 = vpop.f32.mrf.mxu0 }
 0x4ba   :  { %v98_v27 = vadd.f32 %v1247_v7, %v97_v26 }
 0x4c1   :  { %v100_v46 = vpop.f32.mrf.mxu0 }
 0x4c2   :  { %v101_v49 = vadd.f32 %v1247_v7, %v100_v46 }
 0x4c9   :  { %v103_v47 = vpop.f32.mrf.mxu0 }
 0x4d1   :  { %v1339_v48 = vpop.f32.mrf.mxu0 }
 0x52f   :  { %v241_v52 = vpop.f32.mrf.mxu2 }
 0x530   :  { %v244_v53 = vadd.f32 %v241_v52, %v92_v51 }
 0x532   :  { %1077 = vtanh.f32 %v244_v53 }
 0x538   :  { %v1078_v54 = vpop.eup %1077 }
 0x539   :  { %v246_v55 = vmul.f32 %v1078_v54, %v1250_v12 }
 0x53b   :  { %v247_v56 = vadd.f32 %v1252_v13, %v246_v55 }
 0x53d   :  { %250 = vrot.lane.b32.xlu2 %v247_v56, %s1189_s17  ;;  %v248_v59 = vmul.f32 %v247_v56, %v209_v43 }
 0x597   :  { %v251_v57 = vpop.permute.xlu2 %250 }
 0x598   :  { %v253_v58 = vmul.f32 %v251_v57, %v247_v56 }
 0x59a   :  { %255 = vrot.lane.b32.xlu0 %v253_v58, %s1190_s18 }
 0x60c   :  { %v256_v60 = vpop.permute.xlu0 %255 }
 0x60d   :  { %v258_v61 = vadd.f32 %v256_v60, %v248_v59 }
 0x60f   :  { %1079 = vtanh.f32 %v258_v61 }
 0x615   :  { %v1080_v62 = vpop.eup %1079 }
 0x616   :  { %261 = vrot.lane.b32.xlu1 %v1080_v62, %s1189_s17 }
 0x688   :  { %v262_v0 = vpop.permute.xlu1 %261 }
 0x689   :  { %v264_v1 = vmul.f32 %v262_v0, %v247_v56  ;;  %v1350_v0 = vld [vmem:[#allocation4 + $0x58] sm:$0xff] }
 0x68b   :  { %266 = vrot.lane.b32.xlu2 %v264_v1, %s1190_s18  ;;  %v1354_v1 = vld [vmem:[#allocation4 + $0x50] sm:$0xff] }
 0x6e5   :  { %v267_v2 = vpop.permute.xlu2 %266 }
 0x6e6   :  { %269 = vst.msk [vmem:[#allocation3 + $0x10] sm:$0xff] %vm122_vm1, %v267_v2  ;;  %1036 = vmatmul.msk.f32.vlgmr.msrb.gmra.mxu1 %vm122_vm1, %v267_v2  ;;  %v1358_v2 = vld [vmem:[#allocation4 + $0x48] sm:$0xff] }
 0x6e7   :  { %619 = vmatpush.msrb.mxu1 %v1348_v63 }
 0x6e9   :  { %620 = vmatpush.msrb.mxu1 %v1350_v0 }
 0x6eb   :  { %621 = vmatpush.msrb.mxu1 %v1354_v1 }
 0x6ed   :  { %v522_v3 = vld [vmem:[#allocation3 + $0x10] sm:$0xff]  ;;  %622 = vmatpush.msrb.mxu1 %v1358_v2 }
 0x6ee   :  { %1043 = vmatmul.msk.f32.gmra.mxu3 %vm122_vm1, %v522_v3 }
 0x763   :  { %v290_v8 = vpop.f32.mrf.mxu1 }
 0x764   :  { %v293_v9 = vadd.f32 %v290_v8, %v95_v5  ;;  %v104_v5 = vadd.f32 %v1247_v7, %v103_v47 }
 0x766   :  { %1081 = vtanh.f32 %v293_v9 }
 0x76c   :  { %v1082_v10 = vpop.eup %1081 }
 0x76d   :  { %v295_v11 = vmul.f32 %v1082_v10, %v1250_v12  ;;  %v1377_v10 = vld [vmem:[#allocation4 + $0x89] ss:$0 sm:$0xff] }
 0x76f   :  { %v296_v14 = vadd.f32 %v1252_v13, %v295_v11  ;;  %v570_v11 = vpop.f32.mrf.mxu3 }
 0x771   :  { %299 = vrot.lane.b32.xlu0 %v296_v14, %s1189_s17  ;;  %v297_v17 = vmul.f32 %v296_v14, %v258_v61 }
 0x7e3   :  { %v300_v15 = vpop.permute.xlu0 %299 }
 0x7e4   :  { %v302_v16 = vmul.f32 %v300_v15, %v296_v14 }
 0x7e6   :  { %304 = vrot.lane.b32.xlu1 %v302_v16, %s1190_s18 }
 0x858   :  { %v305_v18 = vpop.permute.xlu1 %304 }
 0x859   :  { %v307_v19 = vadd.f32 %v305_v18, %v297_v17 }
 0x85b   :  { %1083 = vtanh.f32 %v307_v19 }
 0x861   :  { %v1084_v20 = vpop.eup %1083 }
 0x862   :  { %310 = vrot.lane.b32.xlu2 %v1084_v20, %s1189_s17 }
 0x8bc   :  { %v311_v21 = vpop.permute.xlu2 %310 }
 0x8bd   :  { %v313_v22 = vmul.f32 %v311_v21, %v296_v14  ;;  %v571_v14 = vadd.f32 %v1377_v10, %v570_v11 }
 0x8bf   :  { %315 = vrot.lane.b32.xlu0 %v313_v22, %s1190_s18 }
 0x931   :  { %v316_v24 = vpop.permute.xlu0 %315 }
 0x932   :  { %318 = vst.msk [vmem:[#allocation3 + $0x18] sm:$0xff] %vm122_vm1, %v316_v24  ;;  %1037 = vmatmul.msk.f32.vlgmr.msra.gmra.mxu2 %vm122_vm1, %v316_v24 }
 0x933   :  { %666 = vmatpush.msra.mxu2 %v1348_v63 }
 0x935   :  { %667 = vmatpush.msra.mxu2 %v1350_v0 }
 0x937   :  { %668 = vmatpush.msra.mxu2 %v1354_v1 }
 0x939   :  { %v523_v25 = vld [vmem:[#allocation3 + $0x18] sm:$0xff]  ;;  %669 = vmatpush.msra.mxu2 %v1358_v2 }
 0x93a   :  { %1044 = vmatmul.msk.f32.gmra.mxu3 %vm122_vm1, %v523_v25 }
 0x9b5   :  { %v339_v28 = vpop.f32.mrf.mxu2 }
 0x9b6   :  { %v342_v29 = vadd.f32 %v339_v28, %v98_v27 }
 0x9b8   :  { %1085 = vtanh.f32 %v342_v29 }
 0x9be   :  { %v1086_v30 = vpop.eup %1085 }
 0x9bf   :  { %v344_v31 = vmul.f32 %v1086_v30, %v1250_v12 }
 0x9c1   :  { %v345_v32 = vadd.f32 %v1252_v13, %v344_v31 }
 0x9c3   :  { %348 = vrot.lane.b32.xlu1 %v345_v32, %s1189_s17  ;;  %v346_v35 = vmul.f32 %v345_v32, %v307_v19 }
 0xa35   :  { %v349_v33 = vpop.permute.xlu1 %348 }
 0xa36   :  { %v351_v34 = vmul.f32 %v349_v33, %v345_v32 }
 0xa38   :  { %353 = vrot.lane.b32.xlu2 %v351_v34, %s1190_s18 }
 0xa92   :  { %v354_v36 = vpop.permute.xlu2 %353 }
 0xa93   :  { %v356_v37 = vadd.f32 %v354_v36, %v346_v35 }
 0xa95   :  { %1087 = vtanh.f32 %v356_v37 }
 0xa9b   :  { %v1088_v38 = vpop.eup %1087 }
 0xa9c   :  { %359 = vrot.lane.b32.xlu0 %v1088_v38, %s1189_s17 }
 0xb0e   :  { %v360_v42 = vpop.permute.xlu0 %359 }
 0xb0f   :  { %v362_v43 = vmul.f32 %v360_v42, %v345_v32  ;;  %v573_v42 = vpop.f32.mrf.mxu3 }
 0xb11   :  { %364 = vrot.lane.b32.xlu1 %v362_v43, %s1190_s18  ;;  %v574_v43 = vadd.f32 %v1377_v10, %v573_v42 }
 0xb83   :  { %v365_v44 = vpop.permute.xlu1 %364 }
 0xb84   :  { %367 = vst.msk [vmem:[#allocation3 + $0x20] sm:$0xff] %vm122_vm1, %v365_v44  ;;  %1038 = vmatmul.msk.f32.vlgmr.msrb.gmra.mxu0 %vm122_vm1, %v365_v44 }
 0xb8b   :  { %v524_v45 = vld [vmem:[#allocation3 + $0x20] sm:$0xff] }
 0xb8c   :  { %1045 = vmatmul.msk.f32.gmra.mxu3 %vm122_vm1, %v524_v45 }
 0xc01   :  { %v388_v50 = vpop.f32.mrf.mxu0 }
 0xc02   :  { %v391_v51 = vadd.f32 %v388_v50, %v101_v49 }
 0xc04   :  { %1089 = vtanh.f32 %v391_v51 }
 0xc0a   :  { %v1090_v52 = vpop.eup %1089 }
 0xc0b   :  { %v393_v53 = vmul.f32 %v1090_v52, %v1250_v12 }
 0xc0d   :  { %v394_v54 = vadd.f32 %v1252_v13, %v393_v53 }
 0xc0f   :  { %397 = vrot.lane.b32.xlu2 %v394_v54, %s1189_s17  ;;  %v395_v57 = vmul.f32 %v394_v54, %v356_v37 }
 0xc69   :  { %v398_v55 = vpop.permute.xlu2 %397 }
 0xc6a   :  { %v400_v56 = vmul.f32 %v398_v55, %v394_v54 }
 0xc6c   :  { %402 = vrot.lane.b32.xlu0 %v400_v56, %s1190_s18 }
 0xcde   :  { %v403_v58 = vpop.permute.xlu0 %402 }
 0xcdf   :  { %v405_v59 = vadd.f32 %v403_v58, %v395_v57 }
 0xce1   :  { %1091 = vtanh.f32 %v405_v59 }
 0xce7   :  { %v1092_v60 = vpop.eup %1091 }
 0xce8   :  { %408 = vrot.lane.b32.xlu1 %v1092_v60, %s1189_s17 }
 0xd5a   :  { %v409_v61 = vpop.permute.xlu1 %408 }
 0xd5b   :  { %v411_v62 = vmul.f32 %v409_v61, %v394_v54 }
 0xd5d   :  { %413 = vrot.lane.b32.xlu2 %v411_v62, %s1190_s18 }
 0xdb7   :  { %v414_v3 = vpop.permute.xlu2 %413 }
 0xdb8   :  { %416 = vst.msk [vmem:[#allocation3 + $0x28] sm:$0xff] %vm122_vm1, %v414_v3  ;;  %1039 = vmatmul.msk.f32.vlgmr.msra.gmra.mxu1 %vm122_vm1, %v414_v3 }
 0xdb9   :  { %713 = vmatpush.msra.mxu1 %v1348_v63 }
 0xdbb   :  { %714 = vmatpush.msra.mxu1 %v1350_v0 }
 0xdbd   :  { %715 = vmatpush.msra.mxu1 %v1354_v1 }
 0xdbf   :  { %v525_v4 = vld [vmem:[#allocation3 + $0x28] sm:$0xff]  ;;  %716 = vmatpush.msra.mxu1 %v1358_v2 }
 0xdc0   :  { %1046 = vmatmul.msk.f32.gmra.mxu3 %vm122_vm1, %v525_v4  ;;  %623 = vmatmul.f32.vlgmr.msrb.gmra.mxu1 %v1188_v6 }
 0xdc1   :  { %807 = vmatpush.msrb.mxu1 %v1348_v63 }
 0xdc3   :  { %808 = vmatpush.msrb.mxu1 %v1350_v0 }
 0xdc5   :  { %809 = vmatpush.msrb.mxu1 %v1354_v1 }
 0xdc7   :  { %810 = vmatpush.msrb.mxu1 %v1358_v2 }
 0xe35   :  { %v437_v8 = vpop.f32.mrf.mxu1 }
 0xe36   :  { %v440_v9 = vadd.f32 %v437_v8, %v104_v5 }
 0xe38   :  { %1093 = vtanh.f32 %v440_v9 }
 0xe3d   :  { %v624_v15 = vpop.f32.mrf.mxu1 }
 0xe3e   :  { %v1094_v6 = vpop.eup %1093  ;;  %v627_v16 = vadd.f32 %v624_v15, %v571_v14 }
 0xe3f   :  { %v442_v17 = vmul.f32 %v1094_v6, %v1250_v12 }
 0xe40   :  { %1095 = vtanh.f32 %v627_v16 }
 0xe41   :  { %v443_v18 = vadd.f32 %v1252_v13, %v442_v17 }
 0xe43   :  { %446 = vrot.lane.b32.xlu0 %v443_v18, %s1189_s17  ;;  %v444_v26 = vmul.f32 %v443_v18, %v405_v59  ;;  %v576_v59 = vpop.f32.mrf.mxu3 }
 0xe44   :  { %v577_v60 = vadd.f32 %v1377_v10, %v576_v59 }
 0xe46   :  { %v1096_v19 = vpop.eup %1095 }
 0xe47   :  { %v629_v20 = vmul.f32 %v1096_v19, %v1250_v12 }
 0xe49   :  { %v630_v21 = vadd.f32 %v1252_v13, %v629_v20 }
 0xe4b   :  { %633 = vrot.lane.b32.xlu1 %v630_v21, %s1189_s17  ;;  %v631_v30 = vmul.f32 0.0, %v630_v21  ;;  %v579_v19 = vpop.f32.mrf.mxu3 }
 0xe4c   :  { %v580_v20 = vadd.f32 %v1377_v10, %v579_v19 }
 0xeb5   :  { %v447_v22 = vpop.permute.xlu0 %446 }
 0xeb6   :  { %v449_v23 = vmul.f32 %v447_v22, %v443_v18 }
 0xeb8   :  { %451 = vrot.lane.b32.xlu2 %v449_v23, %s1190_s18 }
 0xebd   :  { %v634_v24 = vpop.permute.xlu1 %633 }
 0xebe   :  { %v636_v25 = vmul.f32 %v634_v24, %v630_v21 }
 0xec0   :  { %638 = vrot.lane.b32.xlu0 %v636_v25, %s1190_s18 }
 0xf12   :  { %v452_v27 = vpop.permute.xlu2 %451 }
 0xf13   :  { %v1388_v28 = vadd.f32 %v452_v27, %v444_v26 }
 0xf15   :  { %1097 = vtanh.f32 %v1388_v28 }
 0xf1b   :  { %v1098_v29 = vpop.eup %1097 }
 0xf1c   :  { %457 = vrot.lane.b32.xlu1 %v1098_v29, %s1189_s17 }
 0xf32   :  { %v639_v31 = vpop.permute.xlu0 %638 }
 0xf33   :  { %v641_v32 = vadd.f32 %v639_v31, %v631_v30 }
 0xf35   :  { %1099 = vtanh.f32 %v641_v32 }
 0xf3b   :  { %v1100_v33 = vpop.eup %1099 }
 0xf3c   :  { %644 = vrot.lane.b32.xlu2 %v1100_v33, %s1189_s17 }
 0xf8e   :  { %v458_v34 = vpop.permute.xlu1 %457 }
 0xf8f   :  { %v460_v35 = vmul.f32 %v458_v34, %v443_v18 }
 0xf91   :  { %462 = vrot.lane.b32.xlu0 %v460_v35, %s1190_s18 }
 0xf96   :  { %v645_v36 = vpop.permute.xlu2 %644 }
 0xf97   :  { %v647_v37 = vmul.f32 %v645_v36, %v630_v21 }
 0xf99   :  { %650 = vrot.lane.b32.xlu1 %v647_v37, %s1190_s18 }
0x1003   :  { %v463_v38 = vpop.permute.xlu0 %462 }
0x1004   :  { %465 = vst.msk [vmem:[#allocation3 + $0x30] sm:$0xff] %vm122_vm1, %v463_v38  ;;  %1040 = vmatmul.msk.f32.vlgmr.msrb.gmra.mxu2 %vm122_vm1, %v463_v38 }
0x1005   :  { %760 = vmatpush.msrb.mxu2 %v1348_v63 }
0x1007   :  { %761 = vmatpush.msrb.mxu2 %v1350_v0 }
0x1009   :  { %762 = vmatpush.msrb.mxu2 %v1354_v1 }
0x100b   :  { %v651_v39 = vpop.permute.xlu1 %650  ;;  %v526_v40 = vld [vmem:[#allocation3 + $0x30] sm:$0xff]  ;;  %763 = vmatpush.msrb.mxu2 %v1358_v2 }
0x100c   :  { %1047 = vmatmul.msk.f32.gmra.mxu3 %vm122_vm1, %v526_v40  ;;  %1049 = vmatmul.msk.f32.vlgmr.msra.gmra.mxu2 %vm122_vm1, %v651_v39 }
0x100d   :  { %854 = vmatpush.msra.mxu2 %v1348_v63 }
0x100f   :  { %855 = vmatpush.msra.mxu2 %v1350_v0 }
0x1011   :  { %856 = vmatpush.msra.mxu2 %v1354_v1 }
0x1013   :  { %857 = vmatpush.msra.mxu2 %v1358_v2 }
0x1087   :  { %v1407_v41 = vpop.f32.mrf.mxu2 }
0x108f   :  { %v671_v44 = vpop.f32.mrf.mxu2 }
0x1090   :  { %v674_v45 = vadd.f32 %v671_v44, %v574_v43 }
0x1092   :  { %1101 = vtanh.f32 %v674_v45 }
0x1098   :  { %v1102_v46 = vpop.eup %1101 }
0x1099   :  { %v676_v47 = vmul.f32 %v1102_v46, %v1250_v12 }
0x109b   :  { %v677_v49 = vadd.f32 %v1252_v13, %v676_v47 }
0x109d   :  { %680 = vrot.lane.b32.xlu2 %v677_v49, %s1189_s17  ;;  %v678_v52 = vmul.f32 %v677_v49, %v641_v32  ;;  %v582_v32 = vpop.f32.mrf.mxu3 }
0x109e   :  { %v583_v33 = vadd.f32 %v1377_v10, %v582_v32 }
0x10f7   :  { %v681_v50 = vpop.permute.xlu2 %680 }
0x10f8   :  { %v683_v51 = vmul.f32 %v681_v50, %v677_v49  ;;  %v585_v50 = vpop.f32.mrf.mxu3 }
0x10fa   :  { %685 = vrot.lane.b32.xlu0 %v683_v51, %s1190_s18  ;;  %v586_v51 = vadd.f32 %v1377_v10, %v585_v50  ;;  %v978_v50 = vld [vmem:[#allocation4 + $0x70] sm:$0xff] }
0x116c   :  { %v686_v53 = vpop.permute.xlu0 %685 }
0x116d   :  { %v688_v54 = vadd.f32 %v686_v53, %v678_v52 }
0x116f   :  { %1103 = vtanh.f32 %v688_v54 }
0x1175   :  { %v1104_v55 = vpop.eup %1103 }
0x1176   :  { %691 = vrot.lane.b32.xlu1 %v1104_v55, %s1189_s17 }
0x11e8   :  { %v692_v56 = vpop.permute.xlu1 %691 }
0x11e9   :  { %v694_v57 = vmul.f32 %v692_v56, %v677_v49 }
0x11eb   :  { %697 = vrot.lane.b32.xlu2 %v694_v57, %s1190_s18  ;;  %v107_v57 = vadd.f32 %v1247_v7, %v1339_v48 }
0x1245   :  { %v698_v58 = vpop.permute.xlu2 %697 }
0x1246   :  { %1050 = vmatmul.msk.f32.vlgmr.msra.gmra.mxu1 %vm122_vm1, %v698_v58  ;;  %v489_v58 = vadd.f32 %v1407_v41, %v107_v57 }
0x1247   :  { %901 = vmatpush.msra.mxu1 %v1348_v63 }
0x1249   :  { %902 = vmatpush.msra.mxu1 %v1350_v0 }
0x124b   :  { %903 = vmatpush.msra.mxu1 %v1354_v1 }
0x124d   :  { %904 = vmatpush.msra.mxu1 %v1358_v2 }
0x12c3   :  { %v718_v61 = vpop.f32.mrf.mxu1 }
0x12c4   :  { %v721_v62 = vadd.f32 %v718_v61, %v577_v60 }
0x12c6   :  { %1105 = vtanh.f32 %v721_v62 }
0x12cc   :  { %v1106_v3 = vpop.eup %1105 }
0x12cd   :  { %v723_v4 = vmul.f32 %v1106_v3, %v1250_v12 }
0x12cf   :  { %v724_v5 = vadd.f32 %v1252_v13, %v723_v4 }
0x12d1   :  { %727 = vrot.lane.b32.xlu0 %v724_v5, %s1189_s17  ;;  %v725_v11 = vmul.f32 %v724_v5, %v688_v54 }
0x1343   :  { %v728_v8 = vpop.permute.xlu0 %727 }
0x1344   :  { %v730_v9 = vmul.f32 %v728_v8, %v724_v5 }
0x1346   :  { %732 = vrot.lane.b32.xlu1 %v730_v9, %s1190_s18 }
0x13b8   :  { %v733_v14 = vpop.permute.xlu1 %732 }
0x13b9   :  { %v735_v15 = vadd.f32 %v733_v14, %v725_v11 }
0x13bb   :  { %1107 = vtanh.f32 %v735_v15 }
0x13c1   :  { %v1108_v6 = vpop.eup %1107 }
0x13c2   :  { %738 = vrot.lane.b32.xlu2 %v1108_v6, %s1189_s17 }
0x141c   :  { %v739_v16 = vpop.permute.xlu2 %738 }
0x141d   :  { %v741_v17 = vmul.f32 %v739_v16, %v724_v5 }
0x141f   :  { %744 = vrot.lane.b32.xlu0 %v741_v17, %s1190_s18 }
0x1491   :  { %v745_v18 = vpop.permute.xlu0 %744 }
0x1492   :  { %1051 = vmatmul.msk.f32.vlgmr.msrb.gmra.mxu2 %vm122_vm1, %v745_v18 }
0x1493   :  { %948 = vmatpush.msrb.mxu2 %v1348_v63 }
0x1495   :  { %949 = vmatpush.msrb.mxu2 %v1350_v0 }
0x1497   :  { %950 = vmatpush.msrb.mxu2 %v1354_v1 }
0x1499   :  { %951 = vmatpush.msrb.mxu2 %v1358_v2 }
0x1515   :  { %v765_v21 = vpop.f32.mrf.mxu2 }
0x1516   :  { %v768_v22 = vadd.f32 %v765_v21, %v580_v20 }
0x1518   :  { %1109 = vtanh.f32 %v768_v22 }
0x151e   :  { %v1110_v23 = vpop.eup %1109 }
0x151f   :  { %v770_v24 = vmul.f32 %v1110_v23, %v1250_v12 }
0x1521   :  { %v771_v25 = vadd.f32 %v1252_v13, %v770_v24 }
0x1523   :  { %774 = vrot.lane.b32.xlu1 %v771_v25, %s1189_s17  ;;  %v772_v0 = vmul.f32 %v771_v25, %v735_v15  ;;  %v588_v15 = vpop.f32.mrf.mxu3 }
0x1524   :  { %v589_v6 = vadd.f32 %v1377_v10, %v588_v15 }
0x1595   :  { %v775_v63 = vpop.permute.xlu1 %774 }
0x1596   :  { %v777_v26 = vmul.f32 %v775_v63, %v771_v25 }
0x1598   :  { %779 = vrot.lane.b32.xlu2 %v777_v26, %s1190_s18 }
0x15f2   :  { %v780_v1 = vpop.permute.xlu2 %779 }
0x15f3   :  { %v782_v2 = vadd.f32 %v780_v1, %v772_v0 }
0x15f5   :  { %1111 = vtanh.f32 %v782_v2 }
0x15fb   :  { %v1112_v27 = vpop.eup %1111 }
0x15fc   :  { %785 = vrot.lane.b32.xlu0 %v1112_v27, %s1189_s17 }
0x166e   :  { %v786_v29 = vpop.permute.xlu0 %785 }
0x166f   :  { %v788_v30 = vmul.f32 %v786_v29, %v771_v25 }
0x1671   :  { %791 = vrot.lane.b32.xlu1 %v788_v30, %s1190_s18 }
0x16e3   :  { %v792_v31 = vpop.permute.xlu1 %791 }
0x16e4   :  { %1052 = vmatmul.msk.f32.vlgmr.msrb.gmra.mxu1 %vm122_vm1, %v792_v31 }
0x1761   :  { %v812_v34 = vpop.f32.mrf.mxu1 }
0x1762   :  { %v815_v35 = vadd.f32 %v812_v34, %v583_v33 }
0x1764   :  { %1113 = vtanh.f32 %v815_v35 }
0x176a   :  { %v1114_v36 = vpop.eup %1113 }
0x176b   :  { %v817_v37 = vmul.f32 %v1114_v36, %v1250_v12 }
0x176d   :  { %v818_v38 = vadd.f32 %v1252_v13, %v817_v37 }
0x176f   :  { %821 = vrot.lane.b32.xlu2 %v818_v38, %s1189_s17  ;;  %v819_v42 = vmul.f32 %v818_v38, %v782_v2 }
0x17c9   :  { %v822_v39 = vpop.permute.xlu2 %821 }
0x17ca   :  { %v824_v40 = vmul.f32 %v822_v39, %v818_v38 }
0x17cc   :  { %826 = vrot.lane.b32.xlu0 %v824_v40, %s1190_s18 }
0x183e   :  { %v827_v43 = vpop.permute.xlu0 %826 }
0x183f   :  { %v829_v44 = vadd.f32 %v827_v43, %v819_v42 }
0x1841   :  { %1115 = vtanh.f32 %v829_v44 }
0x1847   :  { %v1116_v45 = vpop.eup %1115 }
0x1848   :  { %832 = vrot.lane.b32.xlu1 %v1116_v45, %s1189_s17 }
0x18ba   :  { %v833_v46 = vpop.permute.xlu1 %832 }
0x18bb   :  { %v835_v47 = vmul.f32 %v833_v46, %v818_v38 }
0x18bd   :  { %838 = vrot.lane.b32.xlu2 %v835_v47, %s1190_s18 }
0x1917   :  { %v839_v49 = vpop.permute.xlu2 %838 }
0x1918   :  { %1053 = vmatmul.msk.f32.vlgmr.msra.gmra.mxu2 %vm122_vm1, %v839_v49  ;;  %v979_v49 = vld [vmem:[#allocation4 + $0x78] sm:$0xff] }
0x199b   :  { %v859_v52 = vpop.f32.mrf.mxu2 }
0x199c   :  { %v862_v53 = vadd.f32 %v859_v52, %v586_v51 }
0x199e   :  { %1117 = vtanh.f32 %v862_v53  ;;  %v1068_v53 = vld [vmem:[#allocation4 + $0x8a] ss:$0 sm:$0xff] }
0x199f   :  { %1119 = vtanh.f32 %v489_v58 }
0x19a4   :  { %v1118_v54 = vpop.eup %1117 }
0x19a5   :  { %v864_v55 = vmul.f32 %v1118_v54, %v1250_v12  ;;  %v1120_v61 = vpop.eup %1119 }
0x19a6   :  { %v491_v62 = vmul.f32 %v1120_v61, %v1250_v12 }
0x19a7   :  { %v865_v56 = vadd.f32 %v1252_v13, %v864_v55 }
0x19a8   :  { %v492_v3 = vadd.f32 %v1252_v13, %v491_v62 }
0x19a9   :  { %868 = vrot.lane.b32.xlu0 %v865_v56, %s1189_s17  ;;  %v866_v4 = vmul.f32 %v865_v56, %v829_v44 }
0x19aa   :  { %v493_v20 = vmul.f32 %v492_v3, %v1388_v28 }
0x1a1b   :  { %v869_v59 = vpop.permute.xlu0 %868 }
0x1a1c   :  { %v871_v60 = vmul.f32 %v869_v59, %v865_v56 }
0x1a1e   :  { %873 = vrot.lane.b32.xlu1 %v871_v60, %s1190_s18 }
0x1a26   :  { %495 = vrot.lane.b32.xlu1 %v492_v3, %s1189_s17 }
0x1a90   :  { %v874_v5 = vpop.permute.xlu1 %873 }
0x1a91   :  { %v876_v8 = vadd.f32 %v874_v5, %v866_v4 }
0x1a93   :  { %1121 = vtanh.f32 %v876_v8 }
0x1a98   :  { %v496_v41 = vpop.permute.xlu1 %495 }
0x1a99   :  { %v1122_v9 = vpop.eup %1121  ;;  %v498_v11 = vmul.f32 %v496_v41, %v492_v3 }
0x1a9a   :  { %879 = vrot.lane.b32.xlu2 %v1122_v9, %s1189_s17 }
0x1af4   :  { %v880_v7 = vpop.permute.xlu2 %879 }
0x1af5   :  { %v882_v48 = vmul.f32 %v880_v7, %v865_v56 }
0x1af7   :  { %885 = vrot.lane.b32.xlu0 %v882_v48, %s1190_s18 }
0x1aff   :  { %500 = vrot.lane.b32.xlu0 %v498_v11, %s1190_s18 }
0x1b69   :  { %v886_v14 = vpop.permute.xlu0 %885 }
0x1b6a   :  { %1054 = vmatmul.msk.f32.vlgmr.msra.gmra.mxu1 %vm122_vm1, %v886_v14 }
0x1b71   :  { %v501_v18 = vpop.permute.xlu0 %500 }
0x1b72   :  { %v503_v22 = vadd.f32 %v501_v18, %v493_v20 }
0x1be7   :  { %v906_v16 = vpop.f32.mrf.mxu1 }
0x1be8   :  { %v909_v17 = vadd.f32 %v906_v16, %v589_v6 }
0x1bea   :  { %1123 = vtanh.f32 %v909_v17 }
0x1beb   :  { %1125 = vtanh.f32 %v503_v22 }
0x1bf0   :  { %v1124_v19 = vpop.eup %1123 }
0x1bf1   :  { %v911_v21 = vmul.f32 %v1124_v19, %v1250_v12  ;;  %v1126_v24 = vpop.eup %1125 }
0x1bf3   :  { %v912_v23 = vadd.f32 %v1252_v13, %v911_v21 }
0x1bf5   :  { %915 = vrot.lane.b32.xlu2 %v912_v23, %s1189_s17  ;;  %v913_v28 = vmul.f32 %v912_v23, %v876_v8 }
0x1bfd   :  { %506 = vrot.lane.b32.xlu2 %v1126_v24, %s1189_s17 }
0x1c4f   :  { %v916_v25 = vpop.permute.xlu2 %915 }
0x1c50   :  { %v918_v63 = vmul.f32 %v916_v25, %v912_v23 }
0x1c52   :  { %920 = vrot.lane.b32.xlu1 %v918_v63, %s1190_s18 }
0x1c57   :  { %v507_v26 = vpop.permute.xlu2 %506 }
0x1c58   :  { %v509_v0 = vmul.f32 %v507_v26, %v492_v3 }
0x1c5a   :  { %511 = vrot.lane.b32.xlu1 %v509_v0, %s1190_s18 }
0x1cc4   :  { %v921_v1 = vpop.permute.xlu1 %920 }
0x1cc5   :  { %v923_v2 = vadd.f32 %v921_v1, %v913_v28 }
0x1cc7   :  { %1127 = vtanh.f32 %v923_v2 }
0x1ccc   :  { %v512_v27 = vpop.permute.xlu1 %511 }
0x1ccd   :  { %v1128_v29 = vpop.eup %1127  ;;  %514 = vst.msk [vmem:[#allocation3 + $0x38] sm:$0xff] %vm122_vm1, %v512_v27 }
0x1cce   :  { %926 = vrot.lane.b32.xlu0 %v1128_v29, %s1189_s17 }
0x1cd4   :  { %v527_v30 = vld [vmem:[#allocation3 + $0x38] sm:$0xff] }
0x1cd5   :  { %1048 = vmatmul.msk.f32.gmra.mxu3 %vm122_vm1, %v527_v30 }
0x1d40   :  { %v927_v31 = vpop.permute.xlu0 %926 }
0x1d41   :  { %v929_v32 = vmul.f32 %v927_v31, %v912_v23 }
0x1d43   :  { %932 = vrot.lane.b32.xlu2 %v929_v32, %s1190_s18 }
0x1d58   :  { %v591_v34 = vpop.f32.mrf.mxu3 }
0x1d59   :  { %v592_v35 = vadd.f32 %v1377_v10, %v591_v34  ;;  %v980_v10 = vld [vmem:[#allocation4 + $0x80] sm:$0xff] }
0x1d5a   :  { %1000 = vmatpush.msrb.mxu1 %v980_v10 }
0x1d5c   :  { %1001 = vmatpush.msrb.mxu1 %v979_v49 }
0x1d5e   :  { %1002 = vmatpush.msrb.mxu1 %v978_v50 }
0x1d9d   :  { %v933_v33 = vpop.permute.xlu2 %932 }
0x1d9e   :  { %1055 = vmatmul.msk.f32.vlgmr.msrb.gmra.mxu2 %vm122_vm1, %v933_v33 }
0x1e21   :  { %v953_v36 = vpop.f32.mrf.mxu2 }
0x1e22   :  { %v956_v37 = vadd.f32 %v953_v36, %v592_v35 }
0x1e24   :  { %1129 = vtanh.f32 %v956_v37 }
0x1e2a   :  { %v1130_v38 = vpop.eup %1129 }
0x1e2b   :  { %v958_v39 = vmul.f32 %v1130_v38, %v1250_v12  ;;  %v977_v12 = vld [vmem:[#allocation4 + $0x68] sm:$0xff] }
0x1e2c   :  { %1003 = vmatpush.msrb.mxu1 %v977_v12 }
0x1e2d   :  { %v959_v40 = vadd.f32 %v1252_v13, %v958_v39 }
0x1e2f   :  { %962 = vrot.lane.b32.xlu0 %v959_v40, %s1189_s17  ;;  %v960_v44 = vmul.f32 %v959_v40, %v923_v2 }
0x1ea1   :  { %v963_v42 = vpop.permute.xlu0 %962 }
0x1ea2   :  { %v965_v43 = vmul.f32 %v963_v42, %v959_v40 }
0x1ea4   :  { %967 = vrot.lane.b32.xlu1 %v965_v43, %s1190_s18 }
0x1f16   :  { %v968_v45 = vpop.permute.xlu1 %967 }
0x1f17   :  { %v970_v46 = vadd.f32 %v968_v45, %v960_v44 }
0x1f19   :  { %1131 = vtanh.f32 %v970_v46 }
0x1f1f   :  { %v1132_v47 = vpop.eup %1131 }
0x1f20   :  { %973 = vrot.lane.b32.xlu2 %v1132_v47, %s1189_s17 }
0x1f7a   :  { %v974_v13 = vpop.permute.xlu2 %973 }
0x1f7b   :  { %v976_v51 = vmul.f32 %v974_v13, %v959_v40 }
0x1f7d   :  { %984 = vrot.lane.b32.xlu0 %v976_v51, %s1190_s18 }
0x1fef   :  { %v985_v52 = vpop.permute.xlu0 %984 }
0x1ff0   :  { %1056 = vmatmul.msk.f32.vlgmr.msrb.gmra.mxu1 %vm122_vm1, %v985_v52 }
0x206d   :  { %v1005_v54 = vpop.f32.mrf.mxu1 }
0x206e   :  { %v1006_v55 = vadd.f32 %v1068_v53, %v1005_v54 }
0x2070   :  { %1008 = vst [vmem:[#allocation7] sm:$0xff] %v1006_v55 }
0x2071   :  { %1019 = dma.vmem_to_hbm [thread:$0]  %s1015_s5, 128, %s1017_s8, [#allocation6]  }
0x2072   :  { %1183 = dma.done.wait [#allocation6], 128  }
0x2073   :  { %1184 = vsyncadd [#allocation6], 4294967168 }
0x2074   :  { %1024 = vsyncpa [#allocation5], 1 }
0x2075   :  { %1025 = vsyncpa [#allocation6], 1 }

</bundles_post_ra>
